<compile_context>
chip_gen: v7x
topology: tpu7x:2x2x1
jax: 0.10.0
libtpu: 0.0.40
codegen_flags: <defaults>
</compile_context>

<pallas_src>
import math

import jax
import jax.numpy as jnp
from jax.experimental import pallas as pl
from jax.experimental.pallas import tpu as pltpu


def _round_up(x, m):
    return (x + m - 1) // m * m


def _vmem_limit_bytes():
    """Scoped-VMEM limit: ~100 MiB on 128-MiB parts, ~54 MiB on v7x (64 MiB)."""
    cap = 128 * 1024 * 1024
    try:
        info = pltpu.get_tpu_info()
        cap = int(getattr(info, "vmem_capacity_bytes", cap))
    except Exception:
        pass
    return int(min(100 * 1024 * 1024, cap * 0.85))


def _pick_tiles(n, d_in, h0_dim, h1_dim, out_dim, w_bytes, out_bytes,
                vmem_limit, tile_m, tile_n):
    """Choose (tile_m, tile_n) from the batch size / gene count / VMEM budget."""
    # --- batch (M) tile: <= 512, near-equal split to minimize padded rows -----
    if tile_m is None:
        tile_m_max = 512
        tile_m = _round_up(pl.cdiv(n, pl.cdiv(n, tile_m_max)), 8)
    tile_m = max(8, min(_round_up(tile_m, 8), _round_up(n, 8)))

    # --- gene (N) tile from the VMEM budget -----------------------------------
    if tile_n is None:
        # Fixed VMEM: resident hidden weights/biases (counted double-buffered as a
        # worst case), bf16 h1 scratch, double-buffered z tile, plus slack.
        fixed = (2 * w_bytes * (d_in * h0_dim + h0_dim * h1_dim)
                 + 2 * 4 * (h0_dim + h1_dim)
                 + tile_m * h1_dim * w_bytes
                 + 2 * tile_m * d_in * 4
                 + (2 << 20))
        # Per output column: W2 tile (x2 buffers) + out tile (x2 buffers) + b2.
        per_col = 2 * w_bytes * h1_dim + 2 * out_bytes * tile_m + 2 * 4
        budget = max(int((vmem_limit - fixed) * 0.9), per_col * 128)
        tile_n = budget // per_col
    tile_n = min(int(tile_n), _round_up(out_dim, 128))
    tile_n = max(128, tile_n // 128 * 128)
    if tile_n >= 512:
        tile_n = tile_n // 256 * 256   # 256x256 MXU friendly on v6e/v7x
    return int(tile_m), int(tile_n)


# -----------------------------------------------------------------------------
# Kernel: one (batch tile i, gene tile j) step.
#   j == 0 : h1 = (relu(z @ W0 + b0)) @ W1 + b1        -> bf16 VMEM scratch
#   always : y  = softplus(h1 @ W2[:, j tile] + b2[j tile])
# -----------------------------------------------------------------------------
def _decoder_kernel(z_ref, w0_ref, b0_ref, w1_ref, b1_ref, w2_ref, b2_ref,
                    o_ref, h1_ref):
    # Gene (N) axis is innermost: compute hidden activations only once per batch
    # tile and reuse them from VMEM scratch for every gene tile.
    @pl.when(pl.program_id(1) == 0)
    def _():
        z = z_ref[...].astype(w0_ref.dtype)
        h0 = jnp.dot(z, w0_ref[...], preferred_element_type=jnp.float32)
        h0 = jnp.maximum(h0 + b0_ref[...], 0.0)                 # Linear + ReLU
        h1 = jnp.dot(h0.astype(w1_ref.dtype), w1_ref[...],
                     preferred_element_type=jnp.float32)
        # last hidden layer: no ReLU; store in the scratch dtype (bf16)
        h1_ref[...] = (h1 + b1_ref[...]).astype(h1_ref.dtype)

    # Output module (nb_feature_dispersion): Linear over this gene tile + softplus.
    y = jnp.dot(h1_ref[...], w2_ref[...],
                preferred_element_type=jnp.float32) + b2_ref[...]
    # numerically stable softplus (torch.nn.Softplus, beta=1), in f32
    y = jnp.maximum(y, 0.0) + jnp.log1p(jnp.exp(-jnp.abs(y)))
    o_ref[...] = y.astype(o_ref.dtype)


def decoder_forward(z, params, *, tile_m=None, tile_n=None, out_dtype=jnp.float32):
    """Fused decoder forward pass, tiled over (batch, output genes)."""
    w0, b0 = params["w0"], params["b0"]
    w1, b1 = params["w1"], params["b1"]
    w2, b2 = params["w2"], params["b2"]

    n, d_in = z.shape
    h0_dim = w0.shape[1]
    h1_dim = w1.shape[1]
    out_dim = w2.shape[1]

    vmem_limit = _vmem_limit_bytes()
    w_bytes = jnp.dtype(w2.dtype).itemsize
    out_bytes = jnp.dtype(out_dtype).itemsize
    tile_m, tile_n = _pick_tiles(n, d_in, h0_dim, h1_dim, out_dim,
                                 w_bytes, out_bytes, vmem_limit, tile_m, tile_n)

    # No host-side padding: Pallas pads partial boundary blocks of the inputs and
    # masks partial boundary stores of the output.
    grid = (pl.cdiv(n, tile_m), pl.cdiv(out_dim, tile_n))

    def call(resident_mode):
        def resident(a):
            if resident_mode is None:
                return pl.BlockSpec(a.shape, lambda i, j: (0, 0))
            return pl.BlockSpec(a.shape, lambda i, j: (0, 0),
                                pipeline_mode=resident_mode)

        in_specs = [
            pl.BlockSpec((tile_m, d_in), lambda i, j: (i, 0)),    # z batch tile
            resident(w0), resident(b0),                           # layer 0 (VMEM-resident)
            resident(w1), resident(b1),                           # layer 1 (last hidden)
            pl.BlockSpec((h1_dim, tile_n), lambda i, j: (0, j)),  # W2 gene tile (streamed)
            pl.BlockSpec((1, tile_n), lambda i, j: (0, j)),       # b2 gene tile
        ]
        return pl.pallas_call(
            _decoder_kernel,
            out_shape=jax.ShapeDtypeStruct((n, out_dim), out_dtype),
            grid_spec=pltpu.PrefetchScalarGridSpec(
                num_scalar_prefetch=0,
                grid=grid,
                in_specs=in_specs,
                out_specs=pl.BlockSpec((tile_m, tile_n), lambda i, j: (i, j)),
                # bf16 scratch: halves VMEM and removes the per-gene-tile f32->bf16 cast
                scratch_shapes=[pltpu.VMEM((tile_m, h1_dim), w2.dtype)],
            ),
            compiler_params=pltpu.CompilerParams(
                dimension_semantics=("parallel", "arbitrary"),
                vmem_limit_bytes=vmem_limit,
            ),
        )(z, w0, b0, w1, b1, w2, b2)

    # Single-buffer the never-changing resident weight blocks (saves ~W1-sized
    # VMEM); fall back to default pipelining if this backend rejects Buffered(1).
    try:
        return call(pl.Buffered(1))
    except Exception:
        return call(None)


# -----------------------------------------------------------------------------
# Deterministic parameter init (mimics torch.nn.Linear default init).
# Weights stored pre-transposed (in_features, out_features), bf16; biases f32.
# -----------------------------------------------------------------------------
def init_decoder_params(key, n_input, n_hidden, output_dim, r_init=2.0,
                        weight_dtype=jnp.bfloat16):
    dims = [n_input] + list(n_hidden) + [output_dim]
    params = {}
    for li, (fan_in, fan_out) in enumerate(zip(dims[:-1], dims[1:])):
        key, kw, kb = jax.random.split(key, 3)
        bound = 1.0 / math.sqrt(fan_in)
        w = jax.random.uniform(kw, (fan_in, fan_out), jnp.float32, -bound, bound)
        b = jax.random.uniform(kb, (1, fan_out), jnp.float32, -bound, bound)
        params[f"w{li}"] = w.astype(weight_dtype)
        params[f"b{li}"] = b  # biases stay f32 (added to f32 accumulators)
    # per-gene log_r of OutputModuleNBFeatureDispersion: a module parameter that is
    # NOT used in forward() (only in the NB loss), kept for completeness.
    params["log_r"] = jnp.full((1, output_dim), math.log(r_init), jnp.float32)
    return params


# Pure-JAX reference mirroring the kernel's cast points (correctness check only).
def decoder_forward_ref(z, p):
    f32 = jnp.float32
    wdt = p["w0"].dtype
    h0 = jnp.maximum(
        z.astype(wdt).astype(f32) @ p["w0"].astype(f32) + p["b0"], 0.0)
    h1 = (h0.astype(wdt).astype(f32) @ p["w1"].astype(f32) + p["b1"]).astype(wdt)
    y = h1.astype(f32) @ p["w2"].astype(f32) + p["b2"]
    return jax.nn.softplus(y)


if __name__ == "__main__":
    # Small, module-consistent shapes:
    #   latent dim = 32, hidden layers = [64, 128], output genes = 256, batch = 16.
    batch = 16
    n_input = 32
    n_hidden = [64, 128]
    output_dim = 256

    key = jax.random.PRNGKey(0)
    key, kz = jax.random.split(key)
    z = jax.random.normal(kz, (batch, n_input), dtype=jnp.float32)

    params = init_decoder_params(key, n_input, n_hidden, output_dim, r_init=2.0)
    y_ref = decoder_forward_ref(z, params)

    # Explicit small tiles so the test exercises a 2x2 grid (both axes pipelined).
    y = decoder_forward(z, params, tile_m=8, tile_n=128)
    y = jax.block_until_ready(y)
    assert y.shape == (batch, output_dim)
    assert jnp.allclose(y, y_ref, atol=1e-2, rtol=1e-2), "mismatch vs reference"

    # Auto tile-selection path (VMEM-budgeted tiles, single-tile grid here).
    y2 = jax.block_until_ready(decoder_forward(z, params))
    assert jnp.allclose(y2, y_ref, atol=1e-2, rtol=1e-2), "mismatch (auto tiles)"

    print("KERNEL_OK")
</pallas_src>

<mosaic_0001>
module attributes {stable_mosaic.version = 11 : i64} {
  func.func @_decoder_kernel(%arg0: i32, %arg1: i32, %arg2: memref<8x32xf32, #tpu.memory_space<vmem>>, %arg3: memref<32x64xbf16, #tpu.memory_space<vmem>>, %arg4: memref<1x64xf32, #tpu.memory_space<vmem>>, %arg5: memref<64x128xbf16, #tpu.memory_space<vmem>>, %arg6: memref<1x128xf32, #tpu.memory_space<vmem>>, %arg7: memref<128x128xbf16, #tpu.memory_space<vmem>>, %arg8: memref<1x128xf32, #tpu.memory_space<vmem>>, %arg9: memref<8x128xf32, #tpu.memory_space<vmem>>, %arg10: memref<8x128xbf16, #tpu.memory_space<vmem>>) attributes {dimension_semantics = [#tpu.dimension_semantics<parallel>, #tpu.dimension_semantics<arbitrary>], iteration_bounds = array<i64: 2, 2>, scalar_prefetch = 0 : i64, scratch_operands = 1 : i64, tpu.core_type = #tpu.core_type<tc>, window_params = [{transform_indices = @transform_0, window_bounds = array<i64: 8, 32>}, {pipeline_mode = #tpu.pipeline_mode<synchronous>, transform_indices = @transform_1, window_bounds = array<i64: 32, 64>}, {pipeline_mode = #tpu.pipeline_mode<synchronous>, transform_indices = @transform_2, window_bounds = array<i64: 1, 64>}, {pipeline_mode = #tpu.pipeline_mode<synchronous>, transform_indices = @transform_3, window_bounds = array<i64: 64, 128>}, {pipeline_mode = #tpu.pipeline_mode<synchronous>, transform_indices = @transform_4, window_bounds = array<i64: 1, 128>}, {transform_indices = @transform_5, window_bounds = array<i64: 128, 128>}, {transform_indices = @transform_6, window_bounds = array<i64: 1, 128>}, {transform_indices = @transform_7, window_bounds = array<i64: 8, 128>}]} {
    %c0_i32 = arith.constant 0 : i32
    %0 = arith.cmpi eq, %arg1, %c0_i32 : i32
    %1 = arith.extui %0 : i1 to i32
    %c0_i32_0 = arith.constant 0 : i32
    %2 = arith.cmpi ne, %1, %c0_i32_0 : i32
    scf.if %2 {
      %c0_10 = arith.constant 0 : index
      %c0_11 = arith.constant 0 : index
      %18 = vector.load %arg2[%c0_10, %c0_11] : memref<8x32xf32, #tpu.memory_space<vmem>>, vector<8x32xf32>
      %19 = arith.truncf %18 : vector<8x32xf32> to vector<8x32xbf16>
      %c0_12 = arith.constant 0 : index
      %c0_13 = arith.constant 0 : index
      %20 = vector.load %arg3[%c0_12, %c0_13] : memref<32x64xbf16, #tpu.memory_space<vmem>>, vector<32x64xbf16>
      %cst_14 = arith.constant dense<0.000000e+00> : vector<8x64xf32>
      %21 = tpu.matmul %19, %20, %cst_14 {dimension_numbers = #tpu.dot_dimension_numbers<[1], [0], [0], [1], [0, 0, 1, 1], [], []>} : vector<8x32xbf16>, vector<32x64xbf16>, vector<8x64xf32> -> vector<8x64xf32>
      %c0_15 = arith.constant 0 : index
      %c0_16 = arith.constant 0 : index
      %22 = vector.load %arg4[%c0_15, %c0_16] : memref<1x64xf32, #tpu.memory_space<vmem>>, vector<1x64xf32>
      %23 = vector.broadcast %22 : vector<1x64xf32> to vector<8x64xf32>
      %24 = arith.addf %21, %23 : vector<8x64xf32>
      %cst_17 = arith.constant 0.000000e+00 : f32
      %25 = vector.broadcast %cst_17 : f32 to vector<8x64xf32>
      %26 = arith.maximumf %24, %25 : vector<8x64xf32>
      %27 = arith.truncf %26 : vector<8x64xf32> to vector<8x64xbf16>
      %c0_18 = arith.constant 0 : index
      %c0_19 = arith.constant 0 : index
      %28 = vector.load %arg5[%c0_18, %c0_19] : memref<64x128xbf16, #tpu.memory_space<vmem>>, vector<64x128xbf16>
      %cst_20 = arith.constant dense<0.000000e+00> : vector<8x128xf32>
      %29 = tpu.matmul %27, %28, %cst_20 {dimension_numbers = #tpu.dot_dimension_numbers<[1], [0], [0], [1], [0, 0, 1, 1], [], []>} : vector<8x64xbf16>, vector<64x128xbf16>, vector<8x128xf32> -> vector<8x128xf32>
      %c0_21 = arith.constant 0 : index
      %c0_22 = arith.constant 0 : index
      %30 = vector.load %arg6[%c0_21, %c0_22] : memref<1x128xf32, #tpu.memory_space<vmem>>, vector<1x128xf32>
      %31 = vector.broadcast %30 : vector<1x128xf32> to vector<8x128xf32>
      %32 = arith.addf %29, %31 : vector<8x128xf32>
      %33 = arith.truncf %32 : vector<8x128xf32> to vector<8x128xbf16>
      %c0_23 = arith.constant 0 : index
      %c0_24 = arith.constant 0 : index
      %34 = vector.load %arg10[%c0_23, %c0_24] : memref<8x128xbf16, #tpu.memory_space<vmem>>, vector<8x128xbf16>
      tpu.vector_store %arg10[%c0_23, %c0_24], %33 {strides = array<i32>} : memref<8x128xbf16, #tpu.memory_space<vmem>>, vector<8x128xbf16>,
    } else {
    }
    %c0 = arith.constant 0 : index
    %c0_1 = arith.constant 0 : index
    %3 = vector.load %arg10[%c0, %c0_1] : memref<8x128xbf16, #tpu.memory_space<vmem>>, vector<8x128xbf16>
    %c0_2 = arith.constant 0 : index
    %c0_3 = arith.constant 0 : index
    %4 = vector.load %arg7[%c0_2, %c0_3] : memref<128x128xbf16, #tpu.memory_space<vmem>>, vector<128x128xbf16>
    %cst = arith.constant dense<0.000000e+00> : vector<8x128xf32>
    %5 = tpu.matmul %3, %4, %cst {dimension_numbers = #tpu.dot_dimension_numbers<[1], [0], [0], [1], [0, 0, 1, 1], [], []>} : vector<8x128xbf16>, vector<128x128xbf16>, vector<8x128xf32> -> vector<8x128xf32>
    %c0_4 = arith.constant 0 : index
    %c0_5 = arith.constant 0 : index
    %6 = vector.load %arg8[%c0_4, %c0_5] : memref<1x128xf32, #tpu.memory_space<vmem>>, vector<1x128xf32>
    %7 = vector.broadcast %6 : vector<1x128xf32> to vector<8x128xf32>
    %8 = arith.addf %5, %7 : vector<8x128xf32>
    %cst_6 = arith.constant 0.000000e+00 : f32
    %9 = vector.broadcast %cst_6 : f32 to vector<8x128xf32>
    %10 = arith.maximumf %8, %9 : vector<8x128xf32>
    %11 = math.absf %8 : vector<8x128xf32>
    %cst_7 = arith.constant 0.000000e+00 : f32
    %12 = vector.broadcast %cst_7 : f32 to vector<8x128xf32>
    %13 = arith.subf %12, %11 : vector<8x128xf32>
    %14 = math.exp %13 : vector<8x128xf32>
    %15 = math.log1p %14 : vector<8x128xf32>
    %16 = arith.addf %10, %15 : vector<8x128xf32>
    %c0_8 = arith.constant 0 : index
    %c0_9 = arith.constant 0 : index
    %17 = vector.load %arg9[%c0_8, %c0_9] : memref<8x128xf32, #tpu.memory_space<vmem>>, vector<8x128xf32>
    tpu.vector_store %arg9[%c0_8, %c0_9], %16 {strides = array<i32>} : memref<8x128xf32, #tpu.memory_space<vmem>>, vector<8x128xf32>,
    return
  }
  func.func @transform_0(%arg0: i32, %arg1: i32) -> (i32, i32) {
    %c0_i32 = arith.constant 0 : i32
    %c0_i32_0 = arith.constant 0 : i32
    return %arg0, %c0_i32 : i32, i32
  }
  func.func @transform_1(%arg0: i32, %arg1: i32) -> (i32, i32) {
    %c0_i32 = arith.constant 0 : i32
    %c0_i32_0 = arith.constant 0 : i32
    %c0_i32_1 = arith.constant 0 : i32
    return %c0_i32, %c0_i32_0 : i32, i32
  }
  func.func @transform_2(%arg0: i32, %arg1: i32) -> (i32, i32) {
    %c0_i32 = arith.constant 0 : i32
    %c0_i32_0 = arith.constant 0 : i32
    %c0_i32_1 = arith.constant 0 : i32
    return %c0_i32, %c0_i32_0 : i32, i32
  }
  func.func @transform_3(%arg0: i32, %arg1: i32) -> (i32, i32) {
    %c0_i32 = arith.constant 0 : i32
    %c0_i32_0 = arith.constant 0 : i32
    %c0_i32_1 = arith.constant 0 : i32
    return %c0_i32, %c0_i32_0 : i32, i32
  }
  func.func @transform_4(%arg0: i32, %arg1: i32) -> (i32, i32) {
    %c0_i32 = arith.constant 0 : i32
    %c0_i32_0 = arith.constant 0 : i32
    %c0_i32_1 = arith.constant 0 : i32
    return %c0_i32, %c0_i32_0 : i32, i32
  }
  func.func @transform_5(%arg0: i32, %arg1: i32) -> (i32, i32) {
    %c0_i32 = arith.constant 0 : i32
    %c0_i32_0 = arith.constant 0 : i32
    return %c0_i32, %arg1 : i32, i32
  }
  func.func @transform_6(%arg0: i32, %arg1: i32) -> (i32, i32) {
    %c0_i32 = arith.constant 0 : i32
    %c0_i32_0 = arith.constant 0 : i32
    return %c0_i32, %arg1 : i32, i32
  }
  func.func @transform_7(%arg0: i32, %arg1: i32) -> (i32, i32) {
    %c0_i32 = arith.constant 0 : i32
    return %arg0, %arg1 : i32, i32
  }
}

module attributes {stable_mosaic.version = 11 : i64} {
  func.func @_decoder_kernel(%arg0: i32, %arg1: i32, %arg2: memref<8x32xf32, #tpu.memory_space<vmem>>, %arg3: memref<32x64xbf16, #tpu.memory_space<vmem>>, %arg4: memref<1x64xf32, #tpu.memory_space<vmem>>, %arg5: memref<64x128xbf16, #tpu.memory_space<vmem>>, %arg6: memref<1x128xf32, #tpu.memory_space<vmem>>, %arg7: memref<128x128xbf16, #tpu.memory_space<vmem>>, %arg8: memref<1x128xf32, #tpu.memory_space<vmem>>, %arg9: memref<8x128xf32, #tpu.memory_space<vmem>>, %arg10: memref<8x128xbf16, #tpu.memory_space<vmem>>) attributes {dimension_semantics = [#tpu.dimension_semantics<parallel>, #tpu.dimension_semantics<arbitrary>], iteration_bounds = array<i64: 2, 2>, scalar_prefetch = 0 : i64, scratch_operands = 1 : i64, tpu.core_type = #tpu.core_type<tc>, window_params = [{transform_indices = @transform_0, window_bounds = array<i64: 8, 32>}, {pipeline_mode = #tpu.pipeline_mode<synchronous>, transform_indices = @transform_1, window_bounds = array<i64: 32, 64>}, {pipeline_mode = #tpu.pipeline_mode<synchronous>, transform_indices = @transform_2, window_bounds = array<i64: 1, 64>}, {pipeline_mode = #tpu.pipeline_mode<synchronous>, transform_indices = @transform_3, window_bounds = array<i64: 64, 128>}, {pipeline_mode = #tpu.pipeline_mode<synchronous>, transform_indices = @transform_4, window_bounds = array<i64: 1, 128>}, {transform_indices = @transform_5, window_bounds = array<i64: 128, 128>}, {transform_indices = @transform_6, window_bounds = array<i64: 1, 128>}, {transform_indices = @transform_7, window_bounds = array<i64: 8, 128>}]} {
    %c0_i32 = arith.constant 0 : i32
    %0 = arith.cmpi eq, %arg1, %c0_i32 : i32
    %1 = arith.extui %0 : i1 to i32
    %c0_i32_0 = arith.constant 0 : i32
    %2 = arith.cmpi ne, %1, %c0_i32_0 : i32
    scf.if %2 {
      %c0_10 = arith.constant 0 : index
      %c0_11 = arith.constant 0 : index
      %18 = vector.load %arg2[%c0_10, %c0_11] : memref<8x32xf32, #tpu.memory_space<vmem>>, vector<8x32xf32>
      %19 = arith.truncf %18 : vector<8x32xf32> to vector<8x32xbf16>
      %c0_12 = arith.constant 0 : index
      %c0_13 = arith.constant 0 : index
      %20 = vector.load %arg3[%c0_12, %c0_13] : memref<32x64xbf16, #tpu.memory_space<vmem>>, vector<32x64xbf16>
      %cst_14 = arith.constant dense<0.000000e+00> : vector<8x64xf32>
      %21 = tpu.matmul %19, %20, %cst_14 {dimension_numbers = #tpu.dot_dimension_numbers<[1], [0], [0], [1], [0, 0, 1, 1], [], []>} : vector<8x32xbf16>, vector<32x64xbf16>, vector<8x64xf32> -> vector<8x64xf32>
      %c0_15 = arith.constant 0 : index
      %c0_16 = arith.constant 0 : index
      %22 = vector.load %arg4[%c0_15, %c0_16] : memref<1x64xf32, #tpu.memory_space<vmem>>, vector<1x64xf32>
      %23 = vector.broadcast %22 : vector<1x64xf32> to vector<8x64xf32>
      %24 = arith.addf %21, %23 : vector<8x64xf32>
      %cst_17 = arith.constant 0.000000e+00 : f32
      %25 = vector.broadcast %cst_17 : f32 to vector<8x64xf32>
      %26 = arith.maximumf %24, %25 : vector<8x64xf32>
      %27 = arith.truncf %26 : vector<8x64xf32> to vector<8x64xbf16>
      %c0_18 = arith.constant 0 : index
      %c0_19 = arith.constant 0 : index
      %28 = vector.load %arg5[%c0_18, %c0_19] : memref<64x128xbf16, #tpu.memory_space<vmem>>, vector<64x128xbf16>
      %cst_20 = arith.constant dense<0.000000e+00> : vector<8x128xf32>
      %29 = tpu.matmul %27, %28, %cst_20 {dimension_numbers = #tpu.dot_dimension_numbers<[1], [0], [0], [1], [0, 0, 1, 1], [], []>} : vector<8x64xbf16>, vector<64x128xbf16>, vector<8x128xf32> -> vector<8x128xf32>
      %c0_21 = arith.constant 0 : index
      %c0_22 = arith.constant 0 : index
      %30 = vector.load %arg6[%c0_21, %c0_22] : memref<1x128xf32, #tpu.memory_space<vmem>>, vector<1x128xf32>
      %31 = vector.broadcast %30 : vector<1x128xf32> to vector<8x128xf32>
      %32 = arith.addf %29, %31 : vector<8x128xf32>
      %33 = arith.truncf %32 : vector<8x128xf32> to vector<8x128xbf16>
      %c0_23 = arith.constant 0 : index
      %c0_24 = arith.constant 0 : index
      %34 = vector.load %arg10[%c0_23, %c0_24] : memref<8x128xbf16, #tpu.memory_space<vmem>>, vector<8x128xbf16>
      tpu.vector_store %arg10[%c0_23, %c0_24], %33 {strides = array<i32>} : memref<8x128xbf16, #tpu.memory_space<vmem>>, vector<8x128xbf16>,
    } else {
    }
    %c0 = arith.constant 0 : index
    %c0_1 = arith.constant 0 : index
    %3 = vector.load %arg10[%c0, %c0_1] : memref<8x128xbf16, #tpu.memory_space<vmem>>, vector<8x128xbf16>
    %c0_2 = arith.constant 0 : index
    %c0_3 = arith.constant 0 : index
    %4 = vector.load %arg7[%c0_2, %c0_3] : memref<128x128xbf16, #tpu.memory_space<vmem>>, vector<128x128xbf16>
    %cst = arith.constant dense<0.000000e+00> : vector<8x128xf32>
    %5 = tpu.matmul %3, %4, %cst {dimension_numbers = #tpu.dot_dimension_numbers<[1], [0], [0], [1], [0, 0, 1, 1], [], []>} : vector<8x128xbf16>, vector<128x128xbf16>, vector<8x128xf32> -> vector<8x128xf32>
    %c0_4 = arith.constant 0 : index
    %c0_5 = arith.constant 0 : index
    %6 = vector.load %arg8[%c0_4, %c0_5] : memref<1x128xf32, #tpu.memory_space<vmem>>, vector<1x128xf32>
    %7 = vector.broadcast %6 : vector<1x128xf32> to vector<8x128xf32>
    %8 = arith.addf %5, %7 : vector<8x128xf32>
    %cst_6 = arith.constant 0.000000e+00 : f32
    %9 = vector.broadcast %cst_6 : f32 to vector<8x128xf32>
    %10 = arith.maximumf %8, %9 : vector<8x128xf32>
    %11 = math.absf %8 : vector<8x128xf32>
    %cst_7 = arith.constant 0.000000e+00 : f32
    %12 = vector.broadcast %cst_7 : f32 to vector<8x128xf32>
    %13 = arith.subf %12, %11 : vector<8x128xf32>
    %14 = math.exp %13 : vector<8x128xf32>
    %15 = math.log1p %14 : vector<8x128xf32>
    %16 = arith.addf %10, %15 : vector<8x128xf32>
    %c0_8 = arith.constant 0 : index
    %c0_9 = arith.constant 0 : index
    %17 = vector.load %arg9[%c0_8, %c0_9] : memref<8x128xf32, #tpu.memory_space<vmem>>, vector<8x128xf32>
    tpu.vector_store %arg9[%c0_8, %c0_9], %16 {strides = array<i32>} : memref<8x128xf32, #tpu.memory_space<vmem>>, vector<8x128xf32>,
    return
  }
  func.func @transform_0(%arg0: i32, %arg1: i32) -> (i32, i32) {
    %c0_i32 = arith.constant 0 : i32
    %c0_i32_0 = arith.constant 0 : i32
    return %arg0, %c0_i32 : i32, i32
  }
  func.func @transform_1(%arg0: i32, %arg1: i32) -> (i32, i32) {
    %c0_i32 = arith.constant 0 : i32
    %c0_i32_0 = arith.constant 0 : i32
    %c0_i32_1 = arith.constant 0 : i32
    return %c0_i32, %c0_i32_0 : i32, i32
  }
  func.func @transform_2(%arg0: i32, %arg1: i32) -> (i32, i32) {
    %c0_i32 = arith.constant 0 : i32
    %c0_i32_0 = arith.constant 0 : i32
    %c0_i32_1 = arith.constant 0 : i32
    return %c0_i32, %c0_i32_0 : i32, i32
  }
  func.func @transform_3(%arg0: i32, %arg1: i32) -> (i32, i32) {
    %c0_i32 = arith.constant 0 : i32
    %c0_i32_0 = arith.constant 0 : i32
    %c0_i32_1 = arith.constant 0 : i32
    return %c0_i32, %c0_i32_0 : i32, i32
  }
  func.func @transform_4(%arg0: i32, %arg1: i32) -> (i32, i32) {
    %c0_i32 = arith.constant 0 : i32
    %c0_i32_0 = arith.constant 0 : i32
    %c0_i32_1 = arith.constant 0 : i32
    return %c0_i32, %c0_i32_0 : i32, i32
  }
  func.func @transform_5(%arg0: i32, %arg1: i32) -> (i32, i32) {
    %c0_i32 = arith.constant 0 : i32
    %c0_i32_0 = arith.constant 0 : i32
    return %c0_i32, %arg1 : i32, i32
  }
  func.func @transform_6(%arg0: i32, %arg1: i32) -> (i32, i32) {
    %c0_i32 = arith.constant 0 : i32
    %c0_i32_0 = arith.constant 0 : i32
    return %c0_i32, %arg1 : i32, i32
  }
  func.func @transform_7(%arg0: i32, %arg1: i32) -> (i32, i32) {
    %c0_i32 = arith.constant 0 : i32
    return %arg0, %arg1 : i32, i32
  }
}

</mosaic_0001>

<bundles_post_ra>
// kernel: tpu_custom_call.1
= control target key start
LH: loop header
LB: loop body
LE: loop exit
PB: predicated region body
PF: predicated region fallthrough
CT: control target
= control target key end

     0   :  { %s2120_s0 = inlined_call_operand.hbm [shape: f32[16,32], index: 0, kind: input, shape index: {}]   ;;  %s2121_s1 = inlined_call_operand.hbm [shape: bf16[32,64], index: 1, kind: input, shape index: {}]   ;;  %s2122_s2 = inlined_call_operand.hbm [shape: f32[1,64], index: 2, kind: input, shape index: {}]   ;;  %s2123_s3 = inlined_call_operand.hbm [shape: bf16[64,128], index: 3, kind: input, shape index: {}]   ;;  %s2124_s4 = inlined_call_operand.hbm [shape: f32[1,128], index: 4, kind: input, shape index: {}]   ;;  %s2125_s5 = inlined_call_operand.hbm [shape: bf16[128,256], index: 5, kind: input, shape index: {}]   ;;  %s2126_s6 = inlined_call_operand.hbm [shape: f32[1,256], index: 6, kind: input, shape index: {}]   ;;  %s2127_s7 = inlined_call_operand.hbm [shape: f32[16,256], index: 7, kind: output, shape index: {}]  }
   0x1   :  { %2154 = sst [smem:[#allocation33_spill]] %s2120_s0 }
   0x2   :  { %2155 = sst [smem:[#allocation34_spill]] %s2121_s1 }
   0x3   :  { %2156 = sst [smem:[#allocation35_spill]] %s2122_s2 }
   0x4   :  { %2157 = sst [smem:[#allocation36_spill]] %s2123_s3 }
   0x5   :  { %2158 = sst [smem:[#allocation37_spill]] %s2124_s4 }
   0x6   :  { %2159 = sst [smem:[#allocation38_spill]] %s2125_s5 }
   0x7   :  { %2160 = sst [smem:[#allocation39_spill]] %s2126_s6 }
   0x8   :  { %2161 = sst [smem:[#allocation40_spill]] %s2127_s7 }
   0x9   :  { %12 = vsyncpa [#allocation4], 0 }
   0xa   :  { %14 = vsyncpa [#allocation4 + $0x1], 0 }
   0xb   :  { %15 = vsyncpa [#allocation7], 0 }
   0xc   :  { %16 = vsyncpa [#allocation10], 0 }
   0xd   :  { %17 = vsyncpa [#allocation13], 0 }
   0xe   :  { %19 = vsyncpa [#allocation13 + $0x1], 0 }
   0xf   :  { %20 = vsyncpa [#allocation5], 0 }
  0x10   :  { %22 = vsyncpa [#allocation5 + $0x1], 0  ;;  %s1620_s24 = smov 0   ;;  %s1622_s25 = smov 0  }
  0x11   :  { %s1624_s26 = smov 0   ;;  %s1626_s27 = smov 0  }
  0x12   :  { %s1628_s28 = smov 0   ;;  %s1630_s29 = smov 0  }
  0x13   :  { %s1632_s30 = smov 0   ;;  %s1634_s8 = smov 0  }
  0x14   :  { %s1636_s9 = smov 0   ;;  %s1638_s10 = smov 0  }
  0x15   :  { %s1640_s11 = smov 0   ;;  %s1642_s12 = smov 0  }
  0x16   :  { %s1644_s13 = smov 0   ;;  %s1646_s14 = smov 0  }
  0x17 LB: > { %2162 = sst [smem:[#allocation21_spill]] %s1511_s24  ;;  %s1689_s15 = sadd.s32 4294967295, %s1563_s14   ;;  %s1563_s14 = sphi %s1646_s14, %s28_s14   ;;  %s1559_s13 = sphi %s1644_s13, %s2227_s13   ;;  %s1555_s12 = sphi %s1642_s12, %s2226_s12   ;;  %s1551_s11 = sphi %s1640_s11, %s2225_s11   ;;  %s1547_s10 = sphi %s1638_s10, %s2224_s10   ;;  %s1543_s9 = sphi %s1636_s9, %s2235_s9   ;;  %s1539_s8 = sphi %s1634_s8, %s2234_s8   ;;  %s1535_s30 = sphi %s1632_s30, %s2233_s30   ;;  %s1531_s29 = sphi %s1630_s29, %s2232_s29   ;;  %s1527_s28 = sphi %s1628_s28, %s2231_s28   ;;  %s1523_s27 = sphi %s1626_s27, %s2222_s27   ;;  %s1519_s26 = sphi %s1624_s26, %s2230_s26   ;;  %s1515_s25 = sphi %s1622_s25, %s2229_s25   ;;  %s1511_s24 = sphi %s1620_s24, %s2228_s24  }
  0x18   : > { %2163 = sst [smem:[#allocation22_spill]] %s1527_s28  ;;  %p170_p0 = scmp.ne.s32.totalorder %s1527_s28, %s1523_s27 }
  0x19   : > { %2164 = sst [smem:[#allocation23_spill]] %s1547_s10  ;;  %p2131_p1 = scmp.eq.s32.totalorder %s1689_s15, 0 }
  0x1a   : > { %2165 = sst [smem:[#allocation24_spill]] %s1551_s11  ;;  %p900_p3 = scmp.ge.s32.totalorder %s1563_s14, 1 }
  0x1b   : > { %2166 = sst [smem:[#allocation25_spill]] %s1555_s12  ;;  %p235_p4 = scmp.lt.s32.totalorder %s1563_s14, 5 }
  0x1c   : > { %2167 = sst [smem:[#allocation26_spill]] %s1559_s13  ;;  %p1698_p5 = por %p170_p0, %p2131_p1 }
  0x1d   : > { %p1702_p6 = pnand %p900_p3, %p235_p4  ;;  %s1565_s18 = smov [#allocation6]  }
  0x1e   : > { %s2168_s16 = scalar_select %p1698_p5, 1, 0 }
  0x1f   : > { %s2170_s17 = scalar_select %p1702_p6, 1, 0 }
  0x20   : > { %2169 = sst [smem:[#allocation27_spill]] %s2168_s16  ;;  %s247_s19 = sshll.u32 %s1565_s18, 4  ;;  %s248_s19 = int_to_ptr.vmem [resolvable:$true] %s247_s19 }
  0x21   : > { %2171 = sst [smem:[#allocation28_spill]] %s2170_s17  ;;  %p1025_p7 = pneg %p1702_p6 }
  0x22   : > { %s1566_s21 = smov [#allocation9]   ;;  %s2173_s1 = sld [smem:[#allocation34_spill]] }
  0x23   : > { %p1710_p8 = pnand %p1025_p7, %p2131_p1  ;;  %s271_s22 = sshll.u32 %s1566_s21, 4  ;;  %s1714_s22 = int_to_ptr.vmem [resolvable:$true] %s271_s22 }
  0x25   : > { %s2172_s20 = scalar_select %p1710_p8, 1, 0 }
  0x26   : > { %p1724_p10 = pneg %p1710_p8 }
  0x28   : > { %s1203_s7 = scalar_lea.hbm %s2173_s1, 256 }
  0x29   : > { %p1204_p9 = scmp.ne.s32.totalorder %s2173_s1, %s1203_s7  ;;  %p1210_p13 = scmp.lt.u32.totalorder %s1203_s7, %s2173_s1 }
  0x2b   : > { %p1206_p11 = pnand %p1724_p10, %p1204_p9 }
  0x2d   : > { %p1207_p12 = pneg %p1206_p11 }
  0x2f   : > { %p1212_p0 = pnand %p1210_p13, %p1207_p12 }
  0x31   : > { %1215 = shalt.err (!%p1212_p0)
}
  0x32   : > { %s1216_s23 = scalar_lea.vmem %s248_s19, 256  ;;  %p1224_p2 = scmp.lt.s32.totalorder %s248_s19, %s248_s19 }
  0x33   : > { %p1217_p3 = scmp.ne.s32.totalorder %s248_s19, %s1216_s23  ;;  %p1225_p1 = scmp.lt.s32.totalorder %s1216_s23, %s1216_s23 }
  0x35   : > { %p1219_p4 = pnand %p1217_p3, %p1724_p10  ;;  %p1226_p5 = por %p1225_p1, %p1224_p2 }
  0x37   : > { %p1220_p7 = pneg %p1219_p4 }
  0x39   : > { %p1227_p6 = pnand %p1226_p5, %p1220_p7 }
  0x3b   : > { %1230 = shalt.err (!%p1227_p6)
}
  0x3c   : > { %s1567_s10 = smov 64   ;;  %s1568_s11 = smov 4  }
  0x3d   : > { %1028 = dma.hbm_to_vmem [thread:$0]  (!%p1710_p8), %s2173_s1, 256, %s248_s19, [#allocation7], %s1567_s10, %s1567_s10, %s1568_s11  }
  0x3e   : > { %s2175_s3 = sld [smem:[#allocation36_spill]] }
  0x44   : > { %s1231_s17 = scalar_lea.hbm %s2175_s3, 512 }
  0x45   : > { %p1232_p1 = scmp.ne.s32.totalorder %s2175_s3, %s1231_s17  ;;  %p1238_p6 = scmp.lt.u32.totalorder %s1231_s17, %s2175_s3 }
  0x47   : > { %p1234_p2 = pnand %p1232_p1, %p1724_p10 }
  0x49   : > { %p1235_p5 = pneg %p1234_p2 }
  0x4b   : > { %p1240_p9 = pnand %p1238_p6, %p1235_p5 }
  0x4d   : > { %1243 = shalt.err (!%p1240_p9)
}
  0x4e   : > { %s1244_s19 = scalar_lea.vmem %s1714_s22, 512  ;;  %p1252_p0 = scmp.lt.s32.totalorder %s1714_s22, %s1714_s22 }
  0x4f   : > { %p1245_p11 = scmp.ne.s32.totalorder %s1714_s22, %s1244_s19  ;;  %p1253_p3 = scmp.lt.s32.totalorder %s1244_s19, %s1244_s19 }
  0x51   : > { %p1247_p12 = pnand %p1245_p11, %p1724_p10  ;;  %p1254_p4 = por %p1253_p3, %p1252_p0 }
  0x53   : > { %p1248_p13 = pneg %p1247_p12 }
  0x55   : > { %p1255_p7 = pnand %p1254_p4, %p1248_p13 }
  0x57   : > { %1258 = shalt.err (!%p1255_p7)
}
  0x58   : > { %1034 = dma.hbm_to_vmem [thread:$0]  (!%p1710_p8), %s2175_s3, 512, %s1714_s22, [#allocation10], %s1567_s10, %s1567_s10, %s1568_s11  }
  0x59   : > { %p2139_p1 = scmp.eq.s32.totalorder %s1563_s14, 0  ;;  %p164_p2 = scmp.ne.s32.totalorder %s1531_s29, %s1527_s28 }
  0x5a   : > { %p2138_p5 = scmp.lt.s32.totalorder %s1563_s14, 4  ;;  %s314_s24 = sand.u32 1, %s1563_s14  }
  0x5b   : > { %s2137_s17 = sand.u32 1, %s1531_s29   ;;  %p166_p6 = por %p164_p2, %p2139_p1 }
  0x5c   : > { %s908_s7 = sshll.u32 %s2137_s17, 6  ;;  %s909_s16 = sshll.u32 %s1555_s12, 6 }
  0x5d   : > { %s2176_s5 = sld [smem:[#allocation38_spill]]  ;;  %s318_s22 = scalar_lea.vmem [#allocation12], %s908_s7 }
  0x5e   : > { %s324_s19 = sshll.u32 %s318_s22, 4  ;;  %p1787_p9 = pnand %p2138_p5, %p166_p6  ;;  %s1791_s19 = int_to_ptr.vmem [resolvable:$true] %s324_s19 }
  0x5f   : > { %s1793_s6 = scalar_lea.sflag [#allocation13], %s314_s24 }
  0x60   : > { %s2177_s0 = scalar_select %p1787_p9, 1, 0 }
  0x61   : > { %p2145_p12 = pneg %p1787_p9 }
  0x62   : > { %2178 = sst [smem:[#allocation29_spill]] %s2177_s0 }
  0x63   : > { %s1783_s23 = scalar_lea.hbm %s2176_s5, %s909_s16  ;;  %s1264_s21 = scalar_lea.hbm %s2176_s5, 2048 }
  0x64   : > { %s1259_s27 = scalar_lea.hbm %s1783_s23, 1024  ;;  %p1265_p3 = scmp.lt.u32.totalorder %s1783_s23, %s2176_s5 }
  0x65   : > { %p1260_p11 = scmp.ne.s32.totalorder %s1783_s23, %s1259_s27  ;;  %p1266_p4 = scmp.lt.u32.totalorder %s1264_s21, %s1259_s27 }
  0x66   : > { %p1268_p2 = scmp.lt.u32.totalorder %s1259_s27, %s1783_s23 }
  0x67   : > { %p1262_p13 = pnand %p2145_p12, %p1260_p11  ;;  %p1267_p7 = por %p1266_p4, %p1265_p3 }
  0x69   : > { %p1263_p0 = pneg %p1262_p13  ;;  %p1269_p6 = por %p1268_p2, %p1267_p7 }
  0x6b   : > { %p1270_p5 = pnand %p1269_p6, %p1263_p0 }
  0x6d   : > { %1273 = shalt.err (!%p1270_p5)
}
  0x6e   : > { %s1274_s24 = scalar_lea.vmem %s1791_s19, 1024  ;;  %s1569_s7 = smov [#allocation12]  }
  0x6f   : > { %p1275_p11 = scmp.ne.s32.totalorder %s1791_s19, %s1274_s24  ;;  %s1279_s16 = sshll.u32 %s1569_s7, 4  ;;  %s1280_s16 = int_to_ptr.vmem [resolvable:$false] %s1279_s16 }
  0x70   : > { %s1281_s17 = scalar_lea.vmem %s1280_s16, 2048  ;;  %p1282_p8 = scmp.lt.s32.totalorder %s1791_s19, %s1280_s16 }
  0x71   : > { %p1277_p13 = pnand %p1275_p11, %p2145_p12  ;;  %p1283_p3 = scmp.lt.s32.totalorder %s1281_s17, %s1274_s24 }
  0x73   : > { %p1278_p1 = pneg %p1277_p13  ;;  %p1284_p4 = por %p1283_p3, %p1282_p8 }
  0x75   : > { %p1285_p7 = pnand %p1284_p4, %p1278_p1 }
  0x77   : > { %1288 = shalt.err (!%p1285_p7)
}
  0x78   : > { %s1570_s27 = smov 128   ;;  %s1571_s21 = smov [#allocation8]  }
  0x79   : > { %1044 = dma.hbm_to_vmem [thread:$0]  (!%p1787_p9), %s1783_s23, 1024, %s1791_s19, %s1793_s6, %s1570_s27, %s1567_s10, %s1568_s11  }
  0x7a   : > { %s261_s22 = sshll.u32 %s1571_s21, 4  ;;  %s1572_s7 = smov [#allocation11]   ;;  %s262_s22 = int_to_ptr.vmem [resolvable:$true] %s261_s22 }
  0x7b   : > { %s285_s1 = sshll.u32 %s1572_s7, 4  ;;  %s2179_s2 = sld [smem:[#allocation35_spill]]  ;;  %s286_s1 = int_to_ptr.vmem [resolvable:$true] %s285_s1 }
  0x81   : > { %s1289_s17 = scalar_lea.hbm %s2179_s2, 16 }
  0x82   : > { %p1290_p8 = scmp.ne.s32.totalorder %s2179_s2, %s1289_s17  ;;  %p1296_p0 = scmp.lt.u32.totalorder %s1289_s17, %s2179_s2 }
  0x84   : > { %p1292_p1 = pnand %p1290_p8, %p1724_p10 }
  0x86   : > { %p1293_p5 = pneg %p1292_p1 }
  0x88   : > { %p1298_p2 = pnand %p1296_p0, %p1293_p5 }
  0x8a   : > { %1301 = shalt.err (!%p1298_p2)
}
  0x8b   : > { %s1302_s10 = scalar_lea.vmem %s262_s22, 16  ;;  %s1309_s11 = scalar_lea.vmem %s262_s22, 32 }
  0x8c   : > { %p1303_p6 = scmp.ne.s32.totalorder %s262_s22, %s1302_s10  ;;  %p1310_p3 = scmp.lt.s32.totalorder %s262_s22, %s262_s22 }
  0x8d   : > { %p1311_p4 = scmp.lt.s32.totalorder %s1309_s11, %s1302_s10 }
  0x8e   : > { %p1305_p11 = pnand %p1303_p6, %p1724_p10 }
  0x8f   : > { %p1312_p7 = por %p1311_p4, %p1310_p3 }
  0x90   : > { %p1306_p13 = pneg %p1305_p11 }
  0x92   : > { %p1313_p12 = pnand %p1312_p7, %p1306_p13 }
  0x94   : > { %1316 = shalt.err (!%p1313_p12)
}
  0x95   : > { %p2180_p8 = scmp.ne.s32.totalorder %s2172_s20, 0  ;;  %s2181_s4 = sld [smem:[#allocation37_spill]] }
  0x97   : > { %1031 = dma.hbm_to_vmem [thread:$0]  (!%p2180_p8), %s2179_s2, 16, %s262_s22, [#allocation7]  }
  0x9b   : > { %s1317_s19 = scalar_lea.hbm %s2181_s4, 16 }
  0x9c   : > { %p1318_p1 = scmp.ne.s32.totalorder %s2181_s4, %s1317_s19  ;;  %p1324_p12 = scmp.lt.u32.totalorder %s1317_s19, %s2181_s4 }
  0x9e   : > { %p1320_p5 = pnand %p1318_p1, %p1724_p10 }
  0xa0   : > { %p1321_p0 = pneg %p1320_p5 }
  0xa2   : > { %p1326_p2 = pnand %p1324_p12, %p1321_p0 }
  0xa4   : > { %1329 = shalt.err (!%p1326_p2)
}
  0xa5   : > { %s1330_s16 = scalar_lea.vmem %s286_s1, 16  ;;  %s1337_s22 = scalar_lea.vmem %s286_s1, 32 }
  0xa6   : > { %p1331_p6 = scmp.ne.s32.totalorder %s286_s1, %s1330_s16  ;;  %p1338_p3 = scmp.lt.s32.totalorder %s286_s1, %s286_s1 }
  0xa7   : > { %p1339_p4 = scmp.lt.s32.totalorder %s1337_s22, %s1330_s16 }
  0xa8   : > { %p1333_p11 = pnand %p1331_p6, %p1724_p10 }
  0xa9   : > { %p1340_p7 = por %p1339_p4, %p1338_p3 }
  0xaa   : > { %p1334_p13 = pneg %p1333_p11 }
  0xac   : > { %p1341_p9 = pnand %p1340_p7, %p1334_p13 }
  0xae   : > { %1344 = shalt.err (!%p1341_p9)
}
  0xaf   : > { %1037 = dma.hbm_to_vmem [thread:$0]  (!%p2180_p8), %s2181_s4, 16, %s286_s1, [#allocation10]  }
  0xb0   : > { %s899_s18 = sadd.s32 4294967294, %s1563_s14   ;;  %s37_s20 = sadd.s32 1, %s1555_s12 }
  0xb1   : > { %s40_s10 = sadd.s32 1, %s1559_s13  ;;  %p38_p10 = scmp.ge.s32.totalorder %s37_s20, 2 }
  0xb2   : > { %s47_s11 = sadd.s32 1, %s1543_s9  ;;  %p54_p9 = scmp.ne.s32.totalorder %s1543_s9, %s1539_s8 }
  0xb3   : > { %p60_p1 = scmp.ne.s32.totalorder %s1539_s8, %s1535_s30  ;;  %s2237_s20 = smov (%p38_p10, %s37_s20), 0 }
  0xb4   : > { %2182 = sst [smem:[#allocation30_spill]] %s2237_s20  ;;  %s2239_s10 = smov (!%p38_p10, %s40_s10), %s1559_s13 }
  0xb5   : > { %p2183_p5 = scmp.eq.s32.totalorder %s1563_s14, 0  ;;  %p2185_p0 = scmp.eq.s32.totalorder %s1689_s15, 0 }
  0xb6   : > { %s2187_s30 = sld [smem:[#allocation21_spill]]  ;;  %p42_p2 = scmp.ge.s32.totalorder %s2239_s10, 2 }
  0xb7   : > { %p1872_p8 = por %p2183_p5, %p54_p9  ;;  %p1878_p12 = por %p2185_p0, %p60_p1 }
  0xb8   : > { %s154_s5 = ssub.s32 %s1555_s12, %s2237_s20  ;;  %s157_s28 = sadd.s32 1, %s1531_s29 }
  0xb9   : > { %s2186_s3 = scalar_select %p1878_p12, 1, 0 }
  0xba   : > { %p155_p6 = scmp.eq.s32.totalorder %s154_s5, 0  ;;  %s2241_s10 = smov (%p42_p2, %s2239_s10), 0 }
  0xbb   : > { %2188 = sst [smem:[#allocation31_spill]] %s2241_s10  ;;  %s44_s19 = ssub.s32 %s1559_s13, %s2241_s10 }
  0xbc   : > { %s1888_s23 = scalar_select %p155_p6, %s1531_s29, %s157_s28  }
  0xbd   : > { %s211_s0 = sadd.s32 1, %s1519_s26  ;;  %p45_p11 = scmp.eq.s32.totalorder %s44_s19, 0 }
  0xbe   : > { %s208_s27 = sor.u32 %s154_s5, %s44_s19  ;;  %p221_p3 = scmp.ne.s32.totalorder %s1519_s26, %s1515_s25 }
  0xbf   : > { %p209_p13 = scmp.eq.s32.totalorder %s208_s27, 0  ;;  %p2190_p4 = scmp.eq.s32.totalorder %s1689_s15, 3 }
  0xc0   : > { %s1896_s21 = scalar_select %p45_p11, %s1543_s9, %s47_s11  }
  0xc1   : > { %s1899_s7 = scalar_select %p209_p13, %s1519_s26, %s211_s0  }
  0xc2   : > { %2189 = sst [smem:[#allocation32_spill]] %s1896_s21  ;;  %p1903_p7 = por %p2190_p4, %p221_p3 }
  0xc3   : > { %p227_p10 = scmp.ne.s32.totalorder %s1515_s25, %s2187_s30  ;;  %p228_p9 = scmp.eq.s32.totalorder %s899_s18, 3 }
  0xc4   : > { %s2191_s16 = scalar_select %p1903_p7, 1, 0 }
  0xc5   : > { %s296_s22 = sand.u32 1, %s1543_s9   ;;  %p1910_p1 = por %p228_p9, %p227_p10 }
  0xc6   : > { %s906_s24 = sshll.u32 %s296_s22, 3  ;;  %s907_s5 = sshll.u32 %s1559_s13, 7 }
  0xc7   : > { %s2192_s17 = scalar_select %p1910_p1, 1, 0 }
  0xc8   : > { %s300_s28 = scalar_lea.vmem [#allocation3], %s906_s24  ;;  %s2193_s0 = sld [smem:[#allocation33_spill]] }
  0xc9   : > { %s307_s19 = sshll.u32 %s300_s28, 4  ;;  %p2194_p5 = scmp.lt.s32.totalorder %s1563_s14, 4  ;;  %s1920_s19 = int_to_ptr.vmem [resolvable:$true] %s307_s19 }
  0xca   : > { %s910_s30 = sshll.u32 %s1555_s12, 4  ;;  %s2196_s24 = sand.u32 1, %s1531_s29  }
  0xcb   : > { %p1926_p0 = pnand %p2194_p5, %p1872_p8  ;;  %s1933_s28 = scalar_lea.vmem [#allocation14], %s2196_s24 }
  0xcc   : > { %s2197_s4 = sld [smem:[#allocation39_spill]]  ;;  %s297_s1 = scalar_lea.sflag [#allocation4], %s296_s22 }
  0xcd   : > { %p1347_p8 = pneg %p1926_p0 }
  0xce   : > { %s1918_s2 = scalar_lea.hbm %s2193_s0, %s907_s5  ;;  %s1350_s24 = scalar_lea.hbm %s2193_s0, 256 }
  0xcf   : > { %s1345_s20 = scalar_lea.hbm %s1918_s2, 128  ;;  %p1351_p13 = scmp.lt.u32.totalorder %s1918_s2, %s2193_s0 }
  0xd0   : > { %p1346_p2 = scmp.ne.s32.totalorder %s1918_s2, %s1345_s20  ;;  %p1352_p3 = scmp.lt.u32.totalorder %s1350_s24, %s1345_s20 }
  0xd1   : > { %p1354_p10 = scmp.lt.u32.totalorder %s1345_s20, %s1918_s2 }
  0xd2   : > { %s1939_s10 = scalar_lea.hbm %s2197_s4, %s910_s30  ;;  %p1348_p6 = pnand %p1347_p8, %p1346_p2 }
  0xd3   : > { %p1353_p4 = por %p1352_p3, %p1351_p13 }
  0xd4   : > { %p1349_p11 = pneg %p1348_p6 }
  0xd5   : > { %p1355_p9 = por %p1354_p10, %p1353_p4 }
  0xd7   : > { %p1356_p5 = pnand %p1355_p9, %p1349_p11 }
  0xd9   : > { %1359 = shalt.err (!%p1356_p5)
}
  0xda   : > { %s1360_s22 = scalar_lea.vmem %s1920_s19, 128  ;;  %s1573_s12 = smov [#allocation3]  }
  0xdb   : > { %p1361_p2 = scmp.ne.s32.totalorder %s1920_s19, %s1360_s22  ;;  %s1365_s13 = sshll.u32 %s1573_s12, 4  ;;  %s1366_s13 = int_to_ptr.vmem [resolvable:$false] %s1365_s13 }
  0xdc   : > { %s1367_s21 = scalar_lea.vmem %s1366_s13, 256  ;;  %p1368_p7 = scmp.lt.s32.totalorder %s1920_s19, %s1366_s13 }
  0xdd   : > { %p1363_p6 = pnand %p1361_p2, %p1347_p8  ;;  %p1369_p13 = scmp.lt.s32.totalorder %s1367_s21, %s1360_s22 }
  0xdf   : > { %p1364_p1 = pneg %p1363_p6  ;;  %p1370_p3 = por %p1369_p13, %p1368_p7 }
  0xe1   : > { %p1371_p4 = pnand %p1370_p3, %p1364_p1 }
  0xe3   : > { %1374 = shalt.err (!%p1371_p4)
}
  0xe4   : > { %s2198_s20 = sld [smem:[#allocation29_spill]]  ;;  %s2199_s30 = sshll.u32 %s1933_s28, 4  ;;  %s345_s30 = int_to_ptr.vmem [resolvable:$true] %s2199_s30 }
  0xe5   : > { %1041 = dma.hbm_to_vmem [thread:$0]  (!%p1926_p0), %s1918_s2, 128, %s1920_s19, %s297_s1  }
  0xe6   : > { %s1375_s5 = scalar_lea.hbm %s1939_s10, 16  ;;  %s1380_s18 = scalar_lea.hbm %s2197_s4, 32 }
  0xe7   : > { %p1376_p8 = scmp.ne.s32.totalorder %s1939_s10, %s1375_s5  ;;  %p1381_p9 = scmp.lt.u32.totalorder %s1939_s10, %s2197_s4 }
  0xe8   : > { %p1382_p5 = scmp.lt.u32.totalorder %s1380_s18, %s1375_s5  ;;  %p1384_p6 = scmp.lt.u32.totalorder %s1375_s5, %s1939_s10 }
  0xea   : > { %p2200_p11 = scmp.ne.s32.totalorder %s2198_s20, 0  ;;  %p1383_p2 = por %p1382_p5, %p1381_p9 }
  0xec   : > { %p2201_p10 = pneg %p2200_p11  ;;  %p1385_p0 = por %p1384_p6, %p1383_p2 }
  0xee   : > { %p1378_p7 = pnand %p1376_p8, %p2201_p10 }
  0xf0   : > { %p1379_p1 = pneg %p1378_p7 }
  0xf2   : > { %p1386_p13 = pnand %p1385_p0, %p1379_p1 }
  0xf4   : > { %1389 = shalt.err (!%p1386_p13)
}
  0xf5   : > { %s1390_s2 = scalar_lea.vmem %s345_s30, 16  ;;  %p2202_p4 = pmov %p2201_p10 }
  0xf6   : > { %p1391_p3 = scmp.ne.s32.totalorder %s345_s30, %s1390_s2  ;;  %s1574_s19 = smov [#allocation14]  }
  0xf7   : > { %s1395_s28 = sshll.u32 %s1574_s19, 4  ;;  %s1396_s28 = int_to_ptr.vmem [resolvable:$false] %s1395_s28 }
  0xf8   : > { %p1393_p8 = pnand %p1391_p3, %p2202_p4  ;;  %s1397_s1 = scalar_lea.vmem %s1396_s28, 32 }
  0xf9   : > { %p1398_p7 = scmp.lt.s32.totalorder %s345_s30, %s1396_s28  ;;  %p1399_p12 = scmp.lt.s32.totalorder %s1397_s1, %s1390_s2 }
  0xfa   : > { %p1394_p10 = pneg %p1393_p8 }
  0xfb   : > { %p1400_p5 = por %p1399_p12, %p1398_p7 }
  0xfd   : > { %p1401_p9 = pnand %p1400_p5, %p1394_p10 }
  0xff   : > { %1404 = shalt.err (!%p1401_p9)
}
 0x100   : > { %1047 = dma.hbm_to_vmem [thread:$0]  (!%p2200_p11), %s1939_s10, 16, %s345_s30, %s1793_s6  }
 0x101   : > { %s2203_s12 = sld [smem:[#allocation28_spill]] }
 0x107   : > { %p2204_p1 = scmp.ne.s32.totalorder %s2203_s12, 0 }
 0x108   : > { %s355_s13 = sand.u32 (!%p2204_p1), 1, %s1539_s8   ;;  %p2205_p2 = scmp.ne.s32.totalorder (!%p2204_p1), %s2186_s3, 0 }
 0x109   : > { %353 = sbr.rel (%p2204_p1) target bundleno = 1038 (0x40e), region = 48  ;;  %s1991_s21 = sshll.u32 (!%p2204_p1), %s355_s13, 3 }
 0x10a   : > { %s356_s5 = scalar_lea.sflag (!%p2204_p1), [#allocation4], %s355_s13  ;;  %s359_s11 = scalar_lea.vmem (!%p2204_p1), [#allocation3], %s1991_s21 }
 0x110   : > { %1490 = dma.done.wait (%p2205_p2), %s356_s5, 128  }
 0x111   : > { %1492 = vsyncadd (%p2205_p2), %s356_s5, 4294967168  ;;  %p2206_p12 = scmp.eq.s32.totalorder %s1689_s15, 0 }
 0x113   : > { %1494 = dma.done.wait (%p2206_p12), [#allocation7], 272   ;;  %p2207_p11 = pmov %p2206_p12 }
 0x115   : > { %1496 = vsyncadd (%p2207_p11), [#allocation7], 4294967024  ;;  %p2208_p6 = pmov %p2207_p11 }
 0x117   : > { %1498 = dma.done.wait (%p2208_p6), [#allocation10], 528   ;;  %p2209_p0 = pmov %p2208_p6 }
 0x118   : > { %s2210_s6 = sld [smem:[#allocation22_spill]]  ;;  %s2211_s10 = sld [smem:[#allocation27_spill]] }
 0x119   : > { %1500 = vsyncadd (%p2209_p0), [#allocation10], 4294966768  ;;  %s380_s20 = sand.u32 1, %s1689_s15  }
 0x11a   : > { %s381_s3 = scalar_lea.sflag [#allocation13], %s380_s20 }
 0x11e   : > { %s382_s30 = sand.u32 1, %s2210_s6   ;;  %p2212_p13 = scmp.ne.s32.totalorder %s2211_s10, 0 }
 0x11f   : > { %s917_s27 = sshll.u32 %s382_s30, 6 }
 0x120   : > { %s2008_s18 = scalar_lea.vmem [#allocation12], %s917_s27 }
 0x121   : > { %1502 = dma.done.wait (%p2212_p13), %s381_s3, 1040  }
 0x122   : > { %1504 = vsyncadd (%p2212_p13), %s381_s3, 4294966256  ;;  %s429_s24 = sand.u32 1, %s1515_s25   ;;  %s2019_s2 = scalar_lea.vmem [#allocation14], %s382_s30 }
 0x123   : > { %s2017_s22 = sshll.u32 %s429_s24, 3  ;;  %s2213_s19 = sld [smem:[#allocation23_spill]] }
 0x124   : > { %s431_s15 = scalar_lea.vmem [#allocation15], %s2017_s22 }
 0x129   : > { %p919_p3 = scmp.ne.s32.totalorder %s2213_s19, 0 }
 0x12a   : > { %v1185_v0 = vld [vmem:[#allocation6] sm:$0xff] (!%p919_p3)   ;;  %v1575_v1 = vmov (!%p919_p3), 0.0   ;;  %v1186_v2 = vld [vmem:[#allocation6 + $0x8] sm:$0xff] (!%p919_p3)   ;;  %vm1576_vm0 = vmmov (!%p919_p3), 0   ;;  %v437_v3 = vld [vmem:[%s359_s11] sm:$0xff] (!%p919_p3)  ;;  %vm462_vm1 = vcmask (!%p919_p3), 261120  }
 0x12b   : > { %436 = sbr.rel (%p919_p3) target bundleno = 742 (0x2e6), region = 80  ;;  %961 = vmatprep.subr.bf16.mxu0 (!%p919_p3), %v1575_v1  ;;  %969 = vmatprep.subr.bf16.mxu1 (!%p919_p3), %v1575_v1  ;;  %v1187_v4 = vld [vmem:[#allocation9] sm:$0xff] (!%p919_p3)   ;;  %v1188_v5 = vld [vmem:[#allocation9 + $0x8] sm:$0xff] (!%p919_p3)   ;;  %v438_v6 = vpack.c.bf16 (!%p919_p3), %v437_v3, %v437_v3  ;;  %v1189_v7 = vld [vmem:[#allocation9 + $0x10] sm:$0xff] (!%p919_p3)   ;;  %vm547_vm2 = vcmask (!%p919_p3), 523264  }
 0x12c   : > { %962 = vmatpush3.bf16.msra.mxu0 (!%p919_p3), %v1185_v0  ;;  %965 = vmatprep.mubr.msk.bf16.mxu0 (!%p919_p3), %vm1576_vm0, %v1575_v1  ;;  %v1190_v8 = vld [vmem:[#allocation9 + $0x18] sm:$0xff] (!%p919_p3)   ;;  %v924_v17 = vld [vmem:[#allocation11] ss:$0 sm:$0xff] (!%p919_p3) }
 0x12d   : > { %963 = vmatprep.subr.bf16.mxu0 (!%p919_p3), %v1575_v1  ;;  %977 = vmatprep.mubr.msk.bf16.mxu1 (!%p919_p3), %vm1576_vm0, %v1575_v1  ;;  %v920_v9 = vld [vmem:[#allocation8] ss:$0 sm:$0xff] (!%p919_p3) }
 0x12e   : > { %970 = vmatpush3.bf16.msra.mxu1 (!%p919_p3), %v1187_v4 }
 0x12f   : > { %971 = vmatprep.subr.bf16.mxu1 (!%p919_p3), %v1575_v1 }
 0x130   : > { %964 = vmatpush3.bf16.msra.mxu0 (!%p919_p3), %v1186_v2 }
 0x132   : > { %972 = vmatpush3.bf16.msra.mxu1 %v1188_v5 }
 0x133   : > { %966 = vmatmul.mubr.msk.bf16.vlgmr.msra.gmra.mrb[0].mxu0 %vm462_vm1, %v438_v6  ;;  %973 = vmatprep.subr.bf16.mxu1 %v1575_v1 }
 0x136   : > { %974 = vmatpush3.bf16.msra.mxu1 %v1189_v7 }
 0x137   : > { %975 = vmatprep.subr.bf16.mxu1 %v1575_v1 }
 0x13a   : > { %976 = vmatpush3.bf16.msra.mxu1 %v1190_v8 }
 0x206   : > { %v500_v10 = vpop.f32.mrb[0].mxu0 }
 0x207   : > { %v501_v11 = vadd.f32 %v920_v9, %v500_v10  ;;  %v967_v12 = vpop.f32.mrb[1].mxu0 }
 0x208   : > { %v503_v13 = vpop.f32.mrb[2].mxu0 }
 0x209   : > { %v506_v14 = vmax.f32 %v501_v11, 0.0  ;;  %v968_v15 = vpop.f32.mrb[3].mxu0 }
 0x20b   : > { %v507_v16 = vpack.c.bf16 %v506_v14, %v506_v14 }
 0x20d   : > { %978 = vmatmul.mubr.msk.bf16.vlgmr.msra.gmra.mrb[0].mxu1 %vm547_vm2, %v507_v16 }
 0x2e0   : > { %v585_v18 = vpop.f32.mrb[0].mxu1 }
 0x2e1   : > { %v586_v19 = vadd.f32 %v924_v17, %v585_v18  ;;  %v979_v20 = vpop.f32.mrb[1].mxu1 }
 0x2e2   : > { %v588_v21 = vpop.f32.mrb[2].mxu1 }
 0x2e3   : > { %v591_v22 = vpack.c.bf16 %v586_v19, %v586_v19  ;;  %v980_v23 = vpop.f32.mrb[3].mxu1 }
 0x2e5   : > { %592 = vst [vmem:[#allocation2] sm:$0xf] %v591_v22 }
 0x2e6 PF: > { %v1191_v24 = vld [vmem:[%s2008_s18] sm:$0xff]   ;;  %v1577_v25 = vmov 0.0   ;;  %v1192_v26 = vld [vmem:[%s2008_s18 + $0x8] sm:$0xff]   ;;  %vm1578_vm3 = vmmov 0   ;;  %v1193_v27 = vld [vmem:[%s2008_s18 + $0x10] sm:$0xff]   ;;  %s2214_s28 = sld [smem:[#allocation24_spill]] }
 0x2e7   : > { %981 = vmatprep.subr.bf16.mxu0 %v1577_v25  ;;  %997 = vmatprep.mubr.msk.bf16.mxu0 %vm1578_vm3, %v1577_v25  ;;  %v1194_v28 = vld [vmem:[%s2008_s18 + $0x18] sm:$0xff]   ;;  %v1195_v29 = vld [vmem:[%s2008_s18 + $0x20] sm:$0xff]   ;;  %v1196_v30 = vld [vmem:[%s2008_s18 + $0x28] sm:$0xff]   ;;  %s2215_s1 = sld [smem:[#allocation23_spill]]  ;;  %s737_s5 = sshll.u32 %s431_s15, 4  ;;  %s2041_s5 = int_to_ptr.vmem [resolvable:$true] %s737_s5 }
 0x2e8   : > { %982 = vmatpush3.bf16.msra.mxu0 %v1191_v24  ;;  %v1197_v31 = vld [vmem:[%s2008_s18 + $0x30] sm:$0xff]   ;;  %v1198_v32 = vld [vmem:[%s2008_s18 + $0x38] sm:$0xff]   ;;  %s2216_s10 = sld [smem:[#allocation40_spill]]  ;;  %s722_s27 = scalar_lea.sflag [#allocation5], %s429_s24 }
 0x2e9   : > { %983 = vmatprep.subr.bf16.mxu0 %v1577_v25  ;;  %v930_v34 = vld [vmem:[%s2019_s2] ss:$0 sm:$0xff]  ;;  %s1405_s3 = scalar_lea.vmem %s2041_s5, 128  ;;  %p2218_p8 = scmp.ne.s32.totalorder %s2191_s16, 0 }
 0x2ea   : > { %p1406_p4 = scmp.ne.s32.totalorder %s2041_s5, %s1405_s3  ;;  %s1579_s18 = smov [#allocation15]  }
 0x2eb   : > { %s1409_s2 = sshll.u32 %s1579_s18, 4  ;;  %s1410_s2 = int_to_ptr.vmem [resolvable:$false] %s1409_s2 }
 0x2ec   : > { %984 = vmatpush3.bf16.msra.mxu0 %v1192_v26  ;;  %v593_v33 = vld [vmem:[#allocation2] sm:$0xf]  ;;  %s940_s12 = sshll.u32 %s2214_s28, 1  ;;  %p1407_p10 = pnand %p1406_p4, %p2218_p8 }
 0x2ed   : > { %985 = vmatprep.subr.bf16.mxu0 %v1577_v25  ;;  %s733_s13 = sadd.s32 %s2215_s1, %s940_s12  ;;  %s1411_s19 = scalar_lea.vmem %s1410_s2, 256 }
 0x2ee   : > { %s941_s21 = sshll.u32 %s733_s13, 7  ;;  %s2217_s20 = smov %s2216_s10 }
 0x2ef   : > { %s2039_s30 = scalar_lea.hbm %s2216_s10, %s941_s21  ;;  %p1408_p7 = pneg %p1407_p10 }
 0x2f0   : > { %986 = vmatpush3.bf16.msra.mxu0 %v1193_v27  ;;  %p1412_p5 = scmp.lt.s32.totalorder %s2041_s5, %s1410_s2  ;;  %p1413_p9 = scmp.lt.s32.totalorder %s1411_s19, %s1405_s3 }
 0x2f1   : > { %987 = vmatprep.subr.bf16.mxu0 %v1577_v25 }
 0x2f2   : > { %p1414_p1 = por %p1413_p9, %p1412_p5 }
 0x2f4   : > { %988 = vmatpush3.bf16.msra.mxu0 %v1194_v28  ;;  %p1415_p2 = pnand %p1414_p1, %p1408_p7 }
 0x2f5   : > { %989 = vmatprep.subr.bf16.mxu0 %v1577_v25 }
 0x2f8   : > { %990 = vmatpush3.bf16.msra.mxu0 %v1195_v29 }
 0x2f9   : > { %991 = vmatprep.subr.bf16.mxu0 %v1577_v25 }
 0x2fc   : > { %992 = vmatpush3.bf16.msra.mxu0 %v1196_v30 }
 0x2fd   : > { %993 = vmatprep.subr.bf16.mxu0 %v1577_v25 }
 0x300   : > { %994 = vmatpush3.bf16.msra.mxu0 %v1197_v31 }
 0x301   : > { %995 = vmatprep.subr.bf16.mxu0 %v1577_v25 }
 0x304   : > { %996 = vmatpush3.bf16.msra.mxu0 %v1198_v32 }
 0x307   : > { %998 = vmatmul.mubr.bf16.vlgmr.msra.gmra.mrb[0].mxu0 %v593_v33 }
 0x3da   : > { %v699_v35 = vpop.f32.mrb[0].mxu0 }
 0x3db   : > { %v700_v36 = vadd.f32 %v930_v34, %v699_v35  ;;  %v999_v37 = vpop.f32.mrb[1].mxu0 }
 0x3dc   : > { %v702_v38 = vpop.f32.mrb[2].mxu0 }
 0x3dd   : > { %v706_v39 = vand.u32 2147483647, %v700_v36  ;;  %v1000_v40 = vpop.f32.mrb[3].mxu0  ;;  %v705_v51 = vmax.f32 %v700_v36, 0.0 }
 0x3df   : > { %v707_v41 = vsub.f32 0.0, %v706_v39 }
 0x3e1   : > { %v708_v42 = vmul.f32 1.442695, %v707_v41 }
 0x3e3   : > { %1199 = vpow2.f32 %v708_v42 }
 0x3ed   : > { %v1200_v43 = vpop.eup %1199 }
 0x3ee   : > { %v710_v44 = vadd.f32 1.0, %v1200_v43  ;;  %v713_v45 = vmul.f32 -0.5, %v1200_v43  ;;  %v716_v47 = vand.u32 2147483647, %v1200_v43 }
 0x3f0   : > { %1201 = vlog2.f32 %v710_v44  ;;  %v714_v46 = vadd.f32 1.0, %v713_v45  ;;  %vm717_vm4 = vcmp.lt.f32.partialorder %v716_v47, 0.0004427343 }
 0x3f2   : > { %v715_v50 = vmul.f32 %v1200_v43, %v714_v46 }
 0x3fa   : > { %v1202_v48 = vpop.eup %1201 }
 0x3fb   : > { %v712_v49 = vmul.f32 0.6931472, %v1202_v48 }
 0x3fd   : > { %v718_v52 = vsel %vm717_vm4, %v715_v50, %v712_v49 }
 0x3fe   : > { %v719_v53 = vadd.f32 %v718_v52, %v705_v51 }
 0x400   : > { %720 = vst [vmem:[%s431_s15] sm:$0xff] %v719_v53 }
 0x401   : > { %1418 = shalt.err (!%p1415_p2)
}
 0x402   : > { %s1419_s24 = scalar_lea.hbm %s2039_s30, 128  ;;  %s1423_s28 = scalar_lea.hbm %s2217_s20, 512 }
 0x403   : > { %p1420_p12 = scmp.ne.s32.totalorder %s2039_s30, %s1419_s24  ;;  %p1424_p0 = scmp.lt.u32.totalorder %s2039_s30, %s2217_s20 }
 0x404   : > { %p1425_p13 = scmp.lt.u32.totalorder %s1423_s28, %s1419_s24  ;;  %p1427_p4 = scmp.lt.u32.totalorder %s1419_s24, %s2039_s30 }
 0x405   : > { %p1421_p11 = pnand %p1420_p12, %p2218_p8 }
 0x406   : > { %p1426_p3 = por %p1425_p13, %p1424_p0 }
 0x407   : > { %p1422_p6 = pneg %p1421_p11 }
 0x408   : > { %p1428_p10 = por %p1427_p4, %p1426_p3 }
 0x40a   : > { %p1429_p7 = pnand %p1428_p10, %p1422_p6 }
 0x40c   : > { %1432 = shalt.err (!%p1429_p7)
}
 0x40d   : > { %1023 = dma.vmem_to_hbm [thread:$0]  (%p2218_p8), %s2041_s5, 128, %s2039_s30, %s722_s27  }
 0x40e PF: > { %s2219_s13 = sld [smem:[#allocation21_spill]]  ;;  %p1061_p5 = scmp.ge.s32.totalorder %s1563_s14, 2 }
 0x40f   : > { %p2220_p9 = scmp.ne.s32.totalorder %s2192_s17, 0 }
 0x411   : > { %p1049_p1 = pnand %p1061_p5, %p2220_p9 }
 0x414   : > { %s749_s21 = sand.u32 1, %s2219_s13  }
 0x415   : > { %s750_s11 = scalar_lea.sflag [#allocation5], %s749_s21 }
 0x416   : > { %1506 = dma.done.wait (!%p1049_p1), %s750_s11, 128  }
 0x417   : > { %1508 = vsyncadd (!%p1049_p1), %s750_s11, 4294967168  ;;  %s28_s14 = sadd.s32 1, %s1563_s14   ;;  %s2222_s27 = sld [smem:[#allocation22_spill]] }
 0x418   : > { %p2073_p2 = scmp.ge.s32.totalorder %s28_s14, 6   ;;  %s2223_s16 = sld [smem:[#allocation32_spill]] }
 0x419   : > { %s2224_s10 = sld [smem:[#allocation25_spill]]  ;;  %s2225_s11 = sld [smem:[#allocation26_spill]] }
 0x41a   : > { %s2226_s12 = sld [smem:[#allocation30_spill]]  ;;  %s2227_s13 = sld [smem:[#allocation31_spill]] }
 0x41b   : > { %s2228_s24 = smov %s1515_s25  ;;  %s2229_s25 = smov %s1519_s26 }
 0x41c   : > { %s2230_s26 = smov %s1899_s7  ;;  %s2231_s28 = smov %s1531_s29 }
 0x41d   : > { %s2232_s29 = smov %s1888_s23  ;;  %s2233_s30 = smov %s1539_s8 }
 0x41e   : > { %s2234_s8 = smov %s1543_s9  ;;  %s2235_s9 = smov %s2223_s16 }
 0x41f   :  { %27 = sbr.rel (!%p2073_p2) target bundleno = 23 (0x17), region = 137 }
 0x426   :  { %755 = vsyncpa [#allocation4], 1 }
 0x427   :  { %757 = vsyncpa [#allocation4 + $0x1], 1 }
 0x428   :  { %758 = vsyncpa [#allocation7], 1 }
 0x429   :  { %759 = vsyncpa [#allocation10], 1 }
 0x42a   :  { %760 = vsyncpa [#allocation13], 1 }
 0x42b   :  { %762 = vsyncpa [#allocation13 + $0x1], 1 }
 0x42c   :  { %763 = vsyncpa [#allocation5], 1 }
 0x42d   :  { %765 = vsyncpa [#allocation5 + $0x1], 1 }

// kernel: tpu_custom_call.1
= control target key start
LH: loop header
LB: loop body
LE: loop exit
PB: predicated region body
PF: predicated region fallthrough
CT: control target
= control target key end

     0   :  { %s2120_s0 = inlined_call_operand.hbm [shape: f32[16,32], index: 0, kind: input, shape index: {}]   ;;  %s2121_s1 = inlined_call_operand.hbm [shape: bf16[32,64], index: 1, kind: input, shape index: {}]   ;;  %s2122_s2 = inlined_call_operand.hbm [shape: f32[1,64], index: 2, kind: input, shape index: {}]   ;;  %s2123_s3 = inlined_call_operand.hbm [shape: bf16[64,128], index: 3, kind: input, shape index: {}]   ;;  %s2124_s4 = inlined_call_operand.hbm [shape: f32[1,128], index: 4, kind: input, shape index: {}]   ;;  %s2125_s5 = inlined_call_operand.hbm [shape: bf16[128,256], index: 5, kind: input, shape index: {}]   ;;  %s2126_s6 = inlined_call_operand.hbm [shape: f32[1,256], index: 6, kind: input, shape index: {}]   ;;  %s2127_s7 = inlined_call_operand.hbm [shape: f32[16,256], index: 7, kind: output, shape index: {}]  }
   0x1   :  { %2154 = sst [smem:[#allocation33_spill]] %s2120_s0 }
   0x2   :  { %2155 = sst [smem:[#allocation34_spill]] %s2121_s1 }
   0x3   :  { %2156 = sst [smem:[#allocation35_spill]] %s2122_s2 }
   0x4   :  { %2157 = sst [smem:[#allocation36_spill]] %s2123_s3 }
   0x5   :  { %2158 = sst [smem:[#allocation37_spill]] %s2124_s4 }
   0x6   :  { %2159 = sst [smem:[#allocation38_spill]] %s2125_s5 }
   0x7   :  { %2160 = sst [smem:[#allocation39_spill]] %s2126_s6 }
   0x8   :  { %2161 = sst [smem:[#allocation40_spill]] %s2127_s7 }
   0x9   :  { %12 = vsyncpa [#allocation4], 0 }
   0xa   :  { %14 = vsyncpa [#allocation4 + $0x1], 0 }
   0xb   :  { %15 = vsyncpa [#allocation7], 0 }
   0xc   :  { %16 = vsyncpa [#allocation10], 0 }
   0xd   :  { %17 = vsyncpa [#allocation13], 0 }
   0xe   :  { %19 = vsyncpa [#allocation13 + $0x1], 0 }
   0xf   :  { %20 = vsyncpa [#allocation5], 0 }
  0x10   :  { %22 = vsyncpa [#allocation5 + $0x1], 0  ;;  %s1620_s24 = smov 0   ;;  %s1622_s25 = smov 0  }
  0x11   :  { %s1624_s26 = smov 0   ;;  %s1626_s27 = smov 0  }
  0x12   :  { %s1628_s28 = smov 0   ;;  %s1630_s29 = smov 0  }
  0x13   :  { %s1632_s30 = smov 0   ;;  %s1634_s8 = smov 0  }
  0x14   :  { %s1636_s9 = smov 0   ;;  %s1638_s10 = smov 0  }
  0x15   :  { %s1640_s11 = smov 0   ;;  %s1642_s12 = smov 0  }
  0x16   :  { %s1644_s13 = smov 0   ;;  %s1646_s14 = smov 0  }
  0x17 LB: > { %2162 = sst [smem:[#allocation21_spill]] %s1511_s24  ;;  %s1689_s15 = sadd.s32 4294967295, %s1563_s14   ;;  %s1563_s14 = sphi %s1646_s14, %s28_s14   ;;  %s1559_s13 = sphi %s1644_s13, %s2227_s13   ;;  %s1555_s12 = sphi %s1642_s12, %s2226_s12   ;;  %s1551_s11 = sphi %s1640_s11, %s2225_s11   ;;  %s1547_s10 = sphi %s1638_s10, %s2224_s10   ;;  %s1543_s9 = sphi %s1636_s9, %s2235_s9   ;;  %s1539_s8 = sphi %s1634_s8, %s2234_s8   ;;  %s1535_s30 = sphi %s1632_s30, %s2233_s30   ;;  %s1531_s29 = sphi %s1630_s29, %s2232_s29   ;;  %s1527_s28 = sphi %s1628_s28, %s2231_s28   ;;  %s1523_s27 = sphi %s1626_s27, %s2222_s27   ;;  %s1519_s26 = sphi %s1624_s26, %s2230_s26   ;;  %s1515_s25 = sphi %s1622_s25, %s2229_s25   ;;  %s1511_s24 = sphi %s1620_s24, %s2228_s24  }
  0x18   : > { %2163 = sst [smem:[#allocation22_spill]] %s1527_s28  ;;  %p170_p0 = scmp.ne.s32.totalorder %s1527_s28, %s1523_s27 }
  0x19   : > { %2164 = sst [smem:[#allocation23_spill]] %s1547_s10  ;;  %p2131_p1 = scmp.eq.s32.totalorder %s1689_s15, 0 }
  0x1a   : > { %2165 = sst [smem:[#allocation24_spill]] %s1551_s11  ;;  %p900_p3 = scmp.ge.s32.totalorder %s1563_s14, 1 }
  0x1b   : > { %2166 = sst [smem:[#allocation25_spill]] %s1555_s12  ;;  %p235_p4 = scmp.lt.s32.totalorder %s1563_s14, 5 }
  0x1c   : > { %2167 = sst [smem:[#allocation26_spill]] %s1559_s13  ;;  %p1698_p5 = por %p170_p0, %p2131_p1 }
  0x1d   : > { %p1702_p6 = pnand %p900_p3, %p235_p4  ;;  %s1565_s18 = smov [#allocation6]  }
  0x1e   : > { %s2168_s16 = scalar_select %p1698_p5, 1, 0 }
  0x1f   : > { %s2170_s17 = scalar_select %p1702_p6, 1, 0 }
  0x20   : > { %2169 = sst [smem:[#allocation27_spill]] %s2168_s16  ;;  %s247_s19 = sshll.u32 %s1565_s18, 4  ;;  %s248_s19 = int_to_ptr.vmem [resolvable:$true] %s247_s19 }
  0x21   : > { %2171 = sst [smem:[#allocation28_spill]] %s2170_s17  ;;  %p1025_p7 = pneg %p1702_p6 }
  0x22   : > { %s1566_s21 = smov [#allocation9]   ;;  %s2173_s1 = sld [smem:[#allocation34_spill]] }
  0x23   : > { %p1710_p8 = pnand %p1025_p7, %p2131_p1  ;;  %s271_s22 = sshll.u32 %s1566_s21, 4  ;;  %s1714_s22 = int_to_ptr.vmem [resolvable:$true] %s271_s22 }
  0x25   : > { %s2172_s20 = scalar_select %p1710_p8, 1, 0 }
  0x26   : > { %p1724_p10 = pneg %p1710_p8 }
  0x28   : > { %s1203_s7 = scalar_lea.hbm %s2173_s1, 256 }
  0x29   : > { %p1204_p9 = scmp.ne.s32.totalorder %s2173_s1, %s1203_s7  ;;  %p1210_p13 = scmp.lt.u32.totalorder %s1203_s7, %s2173_s1 }
  0x2b   : > { %p1206_p11 = pnand %p1724_p10, %p1204_p9 }
  0x2d   : > { %p1207_p12 = pneg %p1206_p11 }
  0x2f   : > { %p1212_p0 = pnand %p1210_p13, %p1207_p12 }
  0x31   : > { %1215 = shalt.err (!%p1212_p0)
}
  0x32   : > { %s1216_s23 = scalar_lea.vmem %s248_s19, 256  ;;  %p1224_p2 = scmp.lt.s32.totalorder %s248_s19, %s248_s19 }
  0x33   : > { %p1217_p3 = scmp.ne.s32.totalorder %s248_s19, %s1216_s23  ;;  %p1225_p1 = scmp.lt.s32.totalorder %s1216_s23, %s1216_s23 }
  0x35   : > { %p1219_p4 = pnand %p1217_p3, %p1724_p10  ;;  %p1226_p5 = por %p1225_p1, %p1224_p2 }
  0x37   : > { %p1220_p7 = pneg %p1219_p4 }
  0x39   : > { %p1227_p6 = pnand %p1226_p5, %p1220_p7 }
  0x3b   : > { %1230 = shalt.err (!%p1227_p6)
}
  0x3c   : > { %s1567_s10 = smov 64   ;;  %s1568_s11 = smov 4  }
  0x3d   : > { %1028 = dma.hbm_to_vmem [thread:$0]  (!%p1710_p8), %s2173_s1, 256, %s248_s19, [#allocation7], %s1567_s10, %s1567_s10, %s1568_s11  }
  0x3e   : > { %s2175_s3 = sld [smem:[#allocation36_spill]] }
  0x44   : > { %s1231_s17 = scalar_lea.hbm %s2175_s3, 512 }
  0x45   : > { %p1232_p1 = scmp.ne.s32.totalorder %s2175_s3, %s1231_s17  ;;  %p1238_p6 = scmp.lt.u32.totalorder %s1231_s17, %s2175_s3 }
  0x47   : > { %p1234_p2 = pnand %p1232_p1, %p1724_p10 }
  0x49   : > { %p1235_p5 = pneg %p1234_p2 }
  0x4b   : > { %p1240_p9 = pnand %p1238_p6, %p1235_p5 }
  0x4d   : > { %1243 = shalt.err (!%p1240_p9)
}
  0x4e   : > { %s1244_s19 = scalar_lea.vmem %s1714_s22, 512  ;;  %p1252_p0 = scmp.lt.s32.totalorder %s1714_s22, %s1714_s22 }
  0x4f   : > { %p1245_p11 = scmp.ne.s32.totalorder %s1714_s22, %s1244_s19  ;;  %p1253_p3 = scmp.lt.s32.totalorder %s1244_s19, %s1244_s19 }
  0x51   : > { %p1247_p12 = pnand %p1245_p11, %p1724_p10  ;;  %p1254_p4 = por %p1253_p3, %p1252_p0 }
  0x53   : > { %p1248_p13 = pneg %p1247_p12 }
  0x55   : > { %p1255_p7 = pnand %p1254_p4, %p1248_p13 }
  0x57   : > { %1258 = shalt.err (!%p1255_p7)
}
  0x58   : > { %1034 = dma.hbm_to_vmem [thread:$0]  (!%p1710_p8), %s2175_s3, 512, %s1714_s22, [#allocation10], %s1567_s10, %s1567_s10, %s1568_s11  }
  0x59   : > { %p2139_p1 = scmp.eq.s32.totalorder %s1563_s14, 0  ;;  %p164_p2 = scmp.ne.s32.totalorder %s1531_s29, %s1527_s28 }
  0x5a   : > { %p2138_p5 = scmp.lt.s32.totalorder %s1563_s14, 4  ;;  %s314_s24 = sand.u32 1, %s1563_s14  }
  0x5b   : > { %s2137_s17 = sand.u32 1, %s1531_s29   ;;  %p166_p6 = por %p164_p2, %p2139_p1 }
  0x5c   : > { %s908_s7 = sshll.u32 %s2137_s17, 6  ;;  %s909_s16 = sshll.u32 %s1555_s12, 6 }
  0x5d   : > { %s2176_s5 = sld [smem:[#allocation38_spill]]  ;;  %s318_s22 = scalar_lea.vmem [#allocation12], %s908_s7 }
  0x5e   : > { %s324_s19 = sshll.u32 %s318_s22, 4  ;;  %p1787_p9 = pnand %p2138_p5, %p166_p6  ;;  %s1791_s19 = int_to_ptr.vmem [resolvable:$true] %s324_s19 }
  0x5f   : > { %s1793_s6 = scalar_lea.sflag [#allocation13], %s314_s24 }
  0x60   : > { %s2177_s0 = scalar_select %p1787_p9, 1, 0 }
  0x61   : > { %p2145_p12 = pneg %p1787_p9 }
  0x62   : > { %2178 = sst [smem:[#allocation29_spill]] %s2177_s0 }
  0x63   : > { %s1783_s23 = scalar_lea.hbm %s2176_s5, %s909_s16  ;;  %s1264_s21 = scalar_lea.hbm %s2176_s5, 2048 }
  0x64   : > { %s1259_s27 = scalar_lea.hbm %s1783_s23, 1024  ;;  %p1265_p3 = scmp.lt.u32.totalorder %s1783_s23, %s2176_s5 }
  0x65   : > { %p1260_p11 = scmp.ne.s32.totalorder %s1783_s23, %s1259_s27  ;;  %p1266_p4 = scmp.lt.u32.totalorder %s1264_s21, %s1259_s27 }
  0x66   : > { %p1268_p2 = scmp.lt.u32.totalorder %s1259_s27, %s1783_s23 }
  0x67   : > { %p1262_p13 = pnand %p2145_p12, %p1260_p11  ;;  %p1267_p7 = por %p1266_p4, %p1265_p3 }
  0x69   : > { %p1263_p0 = pneg %p1262_p13  ;;  %p1269_p6 = por %p1268_p2, %p1267_p7 }
  0x6b   : > { %p1270_p5 = pnand %p1269_p6, %p1263_p0 }
  0x6d   : > { %1273 = shalt.err (!%p1270_p5)
}
  0x6e   : > { %s1274_s24 = scalar_lea.vmem %s1791_s19, 1024  ;;  %s1569_s7 = smov [#allocation12]  }
  0x6f   : > { %p1275_p11 = scmp.ne.s32.totalorder %s1791_s19, %s1274_s24  ;;  %s1279_s16 = sshll.u32 %s1569_s7, 4  ;;  %s1280_s16 = int_to_ptr.vmem [resolvable:$false] %s1279_s16 }
  0x70   : > { %s1281_s17 = scalar_lea.vmem %s1280_s16, 2048  ;;  %p1282_p8 = scmp.lt.s32.totalorder %s1791_s19, %s1280_s16 }
  0x71   : > { %p1277_p13 = pnand %p1275_p11, %p2145_p12  ;;  %p1283_p3 = scmp.lt.s32.totalorder %s1281_s17, %s1274_s24 }
  0x73   : > { %p1278_p1 = pneg %p1277_p13  ;;  %p1284_p4 = por %p1283_p3, %p1282_p8 }
  0x75   : > { %p1285_p7 = pnand %p1284_p4, %p1278_p1 }
  0x77   : > { %1288 = shalt.err (!%p1285_p7)
}
  0x78   : > { %s1570_s27 = smov 128   ;;  %s1571_s21 = smov [#allocation8]  }
  0x79   : > { %1044 = dma.hbm_to_vmem [thread:$0]  (!%p1787_p9), %s1783_s23, 1024, %s1791_s19, %s1793_s6, %s1570_s27, %s1567_s10, %s1568_s11  }
  0x7a   : > { %s261_s22 = sshll.u32 %s1571_s21, 4  ;;  %s1572_s7 = smov [#allocation11]   ;;  %s262_s22 = int_to_ptr.vmem [resolvable:$true] %s261_s22 }
  0x7b   : > { %s285_s1 = sshll.u32 %s1572_s7, 4  ;;  %s2179_s2 = sld [smem:[#allocation35_spill]]  ;;  %s286_s1 = int_to_ptr.vmem [resolvable:$true] %s285_s1 }
  0x81   : > { %s1289_s17 = scalar_lea.hbm %s2179_s2, 16 }
  0x82   : > { %p1290_p8 = scmp.ne.s32.totalorder %s2179_s2, %s1289_s17  ;;  %p1296_p0 = scmp.lt.u32.totalorder %s1289_s17, %s2179_s2 }
  0x84   : > { %p1292_p1 = pnand %p1290_p8, %p1724_p10 }
  0x86   : > { %p1293_p5 = pneg %p1292_p1 }
  0x88   : > { %p1298_p2 = pnand %p1296_p0, %p1293_p5 }
  0x8a   : > { %1301 = shalt.err (!%p1298_p2)
}
  0x8b   : > { %s1302_s10 = scalar_lea.vmem %s262_s22, 16  ;;  %s1309_s11 = scalar_lea.vmem %s262_s22, 32 }
  0x8c   : > { %p1303_p6 = scmp.ne.s32.totalorder %s262_s22, %s1302_s10  ;;  %p1310_p3 = scmp.lt.s32.totalorder %s262_s22, %s262_s22 }
  0x8d   : > { %p1311_p4 = scmp.lt.s32.totalorder %s1309_s11, %s1302_s10 }
  0x8e   : > { %p1305_p11 = pnand %p1303_p6, %p1724_p10 }
  0x8f   : > { %p1312_p7 = por %p1311_p4, %p1310_p3 }
  0x90   : > { %p1306_p13 = pneg %p1305_p11 }
  0x92   : > { %p1313_p12 = pnand %p1312_p7, %p1306_p13 }
  0x94   : > { %1316 = shalt.err (!%p1313_p12)
}
  0x95   : > { %p2180_p8 = scmp.ne.s32.totalorder %s2172_s20, 0  ;;  %s2181_s4 = sld [smem:[#allocation37_spill]] }
  0x97   : > { %1031 = dma.hbm_to_vmem [thread:$0]  (!%p2180_p8), %s2179_s2, 16, %s262_s22, [#allocation7]  }
  0x9b   : > { %s1317_s19 = scalar_lea.hbm %s2181_s4, 16 }
  0x9c   : > { %p1318_p1 = scmp.ne.s32.totalorder %s2181_s4, %s1317_s19  ;;  %p1324_p12 = scmp.lt.u32.totalorder %s1317_s19, %s2181_s4 }
  0x9e   : > { %p1320_p5 = pnand %p1318_p1, %p1724_p10 }
  0xa0   : > { %p1321_p0 = pneg %p1320_p5 }
  0xa2   : > { %p1326_p2 = pnand %p1324_p12, %p1321_p0 }
  0xa4   : > { %1329 = shalt.err (!%p1326_p2)
}
  0xa5   : > { %s1330_s16 = scalar_lea.vmem %s286_s1, 16  ;;  %s1337_s22 = scalar_lea.vmem %s286_s1, 32 }
  0xa6   : > { %p1331_p6 = scmp.ne.s32.totalorder %s286_s1, %s1330_s16  ;;  %p1338_p3 = scmp.lt.s32.totalorder %s286_s1, %s286_s1 }
  0xa7   : > { %p1339_p4 = scmp.lt.s32.totalorder %s1337_s22, %s1330_s16 }
  0xa8   : > { %p1333_p11 = pnand %p1331_p6, %p1724_p10 }
  0xa9   : > { %p1340_p7 = por %p1339_p4, %p1338_p3 }
  0xaa   : > { %p1334_p13 = pneg %p1333_p11 }
  0xac   : > { %p1341_p9 = pnand %p1340_p7, %p1334_p13 }
  0xae   : > { %1344 = shalt.err (!%p1341_p9)
}
  0xaf   : > { %1037 = dma.hbm_to_vmem [thread:$0]  (!%p2180_p8), %s2181_s4, 16, %s286_s1, [#allocation10]  }
  0xb0   : > { %s899_s18 = sadd.s32 4294967294, %s1563_s14   ;;  %s37_s20 = sadd.s32 1, %s1555_s12 }
  0xb1   : > { %s40_s10 = sadd.s32 1, %s1559_s13  ;;  %p38_p10 = scmp.ge.s32.totalorder %s37_s20, 2 }
  0xb2   : > { %s47_s11 = sadd.s32 1, %s1543_s9  ;;  %p54_p9 = scmp.ne.s32.totalorder %s1543_s9, %s1539_s8 }
  0xb3   : > { %p60_p1 = scmp.ne.s32.totalorder %s1539_s8, %s1535_s30  ;;  %s2237_s20 = smov (%p38_p10, %s37_s20), 0 }
  0xb4   : > { %2182 = sst [smem:[#allocation30_spill]] %s2237_s20  ;;  %s2239_s10 = smov (!%p38_p10, %s40_s10), %s1559_s13 }
  0xb5   : > { %p2183_p5 = scmp.eq.s32.totalorder %s1563_s14, 0  ;;  %p2185_p0 = scmp.eq.s32.totalorder %s1689_s15, 0 }
  0xb6   : > { %s2187_s30 = sld [smem:[#allocation21_spill]]  ;;  %p42_p2 = scmp.ge.s32.totalorder %s2239_s10, 2 }
  0xb7   : > { %p1872_p8 = por %p2183_p5, %p54_p9  ;;  %p1878_p12 = por %p2185_p0, %p60_p1 }
  0xb8   : > { %s154_s5 = ssub.s32 %s1555_s12, %s2237_s20  ;;  %s157_s28 = sadd.s32 1, %s1531_s29 }
  0xb9   : > { %s2186_s3 = scalar_select %p1878_p12, 1, 0 }
  0xba   : > { %p155_p6 = scmp.eq.s32.totalorder %s154_s5, 0  ;;  %s2241_s10 = smov (%p42_p2, %s2239_s10), 0 }
  0xbb   : > { %2188 = sst [smem:[#allocation31_spill]] %s2241_s10  ;;  %s44_s19 = ssub.s32 %s1559_s13, %s2241_s10 }
  0xbc   : > { %s1888_s23 = scalar_select %p155_p6, %s1531_s29, %s157_s28  }
  0xbd   : > { %s211_s0 = sadd.s32 1, %s1519_s26  ;;  %p45_p11 = scmp.eq.s32.totalorder %s44_s19, 0 }
  0xbe   : > { %s208_s27 = sor.u32 %s154_s5, %s44_s19  ;;  %p221_p3 = scmp.ne.s32.totalorder %s1519_s26, %s1515_s25 }
  0xbf   : > { %p209_p13 = scmp.eq.s32.totalorder %s208_s27, 0  ;;  %p2190_p4 = scmp.eq.s32.totalorder %s1689_s15, 3 }
  0xc0   : > { %s1896_s21 = scalar_select %p45_p11, %s1543_s9, %s47_s11  }
  0xc1   : > { %s1899_s7 = scalar_select %p209_p13, %s1519_s26, %s211_s0  }
  0xc2   : > { %2189 = sst [smem:[#allocation32_spill]] %s1896_s21  ;;  %p1903_p7 = por %p2190_p4, %p221_p3 }
  0xc3   : > { %p227_p10 = scmp.ne.s32.totalorder %s1515_s25, %s2187_s30  ;;  %p228_p9 = scmp.eq.s32.totalorder %s899_s18, 3 }
  0xc4   : > { %s2191_s16 = scalar_select %p1903_p7, 1, 0 }
  0xc5   : > { %s296_s22 = sand.u32 1, %s1543_s9   ;;  %p1910_p1 = por %p228_p9, %p227_p10 }
  0xc6   : > { %s906_s24 = sshll.u32 %s296_s22, 3  ;;  %s907_s5 = sshll.u32 %s1559_s13, 7 }
  0xc7   : > { %s2192_s17 = scalar_select %p1910_p1, 1, 0 }
  0xc8   : > { %s300_s28 = scalar_lea.vmem [#allocation3], %s906_s24  ;;  %s2193_s0 = sld [smem:[#allocation33_spill]] }
  0xc9   : > { %s307_s19 = sshll.u32 %s300_s28, 4  ;;  %p2194_p5 = scmp.lt.s32.totalorder %s1563_s14, 4  ;;  %s1920_s19 = int_to_ptr.vmem [resolvable:$true] %s307_s19 }
  0xca   : > { %s910_s30 = sshll.u32 %s1555_s12, 4  ;;  %s2196_s24 = sand.u32 1, %s1531_s29  }
  0xcb   : > { %p1926_p0 = pnand %p2194_p5, %p1872_p8  ;;  %s1933_s28 = scalar_lea.vmem [#allocation14], %s2196_s24 }
  0xcc   : > { %s2197_s4 = sld [smem:[#allocation39_spill]]  ;;  %s297_s1 = scalar_lea.sflag [#allocation4], %s296_s22 }
  0xcd   : > { %p1347_p8 = pneg %p1926_p0 }
  0xce   : > { %s1918_s2 = scalar_lea.hbm %s2193_s0, %s907_s5  ;;  %s1350_s24 = scalar_lea.hbm %s2193_s0, 256 }
  0xcf   : > { %s1345_s20 = scalar_lea.hbm %s1918_s2, 128  ;;  %p1351_p13 = scmp.lt.u32.totalorder %s1918_s2, %s2193_s0 }
  0xd0   : > { %p1346_p2 = scmp.ne.s32.totalorder %s1918_s2, %s1345_s20  ;;  %p1352_p3 = scmp.lt.u32.totalorder %s1350_s24, %s1345_s20 }
  0xd1   : > { %p1354_p10 = scmp.lt.u32.totalorder %s1345_s20, %s1918_s2 }
  0xd2   : > { %s1939_s10 = scalar_lea.hbm %s2197_s4, %s910_s30  ;;  %p1348_p6 = pnand %p1347_p8, %p1346_p2 }
  0xd3   : > { %p1353_p4 = por %p1352_p3, %p1351_p13 }
  0xd4   : > { %p1349_p11 = pneg %p1348_p6 }
  0xd5   : > { %p1355_p9 = por %p1354_p10, %p1353_p4 }
  0xd7   : > { %p1356_p5 = pnand %p1355_p9, %p1349_p11 }
  0xd9   : > { %1359 = shalt.err (!%p1356_p5)
}
  0xda   : > { %s1360_s22 = scalar_lea.vmem %s1920_s19, 128  ;;  %s1573_s12 = smov [#allocation3]  }
  0xdb   : > { %p1361_p2 = scmp.ne.s32.totalorder %s1920_s19, %s1360_s22  ;;  %s1365_s13 = sshll.u32 %s1573_s12, 4  ;;  %s1366_s13 = int_to_ptr.vmem [resolvable:$false] %s1365_s13 }
  0xdc   : > { %s1367_s21 = scalar_lea.vmem %s1366_s13, 256  ;;  %p1368_p7 = scmp.lt.s32.totalorder %s1920_s19, %s1366_s13 }
  0xdd   : > { %p1363_p6 = pnand %p1361_p2, %p1347_p8  ;;  %p1369_p13 = scmp.lt.s32.totalorder %s1367_s21, %s1360_s22 }
  0xdf   : > { %p1364_p1 = pneg %p1363_p6  ;;  %p1370_p3 = por %p1369_p13, %p1368_p7 }
  0xe1   : > { %p1371_p4 = pnand %p1370_p3, %p1364_p1 }
  0xe3   : > { %1374 = shalt.err (!%p1371_p4)
}
  0xe4   : > { %s2198_s20 = sld [smem:[#allocation29_spill]]  ;;  %s2199_s30 = sshll.u32 %s1933_s28, 4  ;;  %s345_s30 = int_to_ptr.vmem [resolvable:$true] %s2199_s30 }
  0xe5   : > { %1041 = dma.hbm_to_vmem [thread:$0]  (!%p1926_p0), %s1918_s2, 128, %s1920_s19, %s297_s1  }
  0xe6   : > { %s1375_s5 = scalar_lea.hbm %s1939_s10, 16  ;;  %s1380_s18 = scalar_lea.hbm %s2197_s4, 32 }
  0xe7   : > { %p1376_p8 = scmp.ne.s32.totalorder %s1939_s10, %s1375_s5  ;;  %p1381_p9 = scmp.lt.u32.totalorder %s1939_s10, %s2197_s4 }
  0xe8   : > { %p1382_p5 = scmp.lt.u32.totalorder %s1380_s18, %s1375_s5  ;;  %p1384_p6 = scmp.lt.u32.totalorder %s1375_s5, %s1939_s10 }
  0xea   : > { %p2200_p11 = scmp.ne.s32.totalorder %s2198_s20, 0  ;;  %p1383_p2 = por %p1382_p5, %p1381_p9 }
  0xec   : > { %p2201_p10 = pneg %p2200_p11  ;;  %p1385_p0 = por %p1384_p6, %p1383_p2 }
  0xee   : > { %p1378_p7 = pnand %p1376_p8, %p2201_p10 }
  0xf0   : > { %p1379_p1 = pneg %p1378_p7 }
  0xf2   : > { %p1386_p13 = pnand %p1385_p0, %p1379_p1 }
  0xf4   : > { %1389 = shalt.err (!%p1386_p13)
}
  0xf5   : > { %s1390_s2 = scalar_lea.vmem %s345_s30, 16  ;;  %p2202_p4 = pmov %p2201_p10 }
  0xf6   : > { %p1391_p3 = scmp.ne.s32.totalorder %s345_s30, %s1390_s2  ;;  %s1574_s19 = smov [#allocation14]  }
  0xf7   : > { %s1395_s28 = sshll.u32 %s1574_s19, 4  ;;  %s1396_s28 = int_to_ptr.vmem [resolvable:$false] %s1395_s28 }
  0xf8   : > { %p1393_p8 = pnand %p1391_p3, %p2202_p4  ;;  %s1397_s1 = scalar_lea.vmem %s1396_s28, 32 }
  0xf9   : > { %p1398_p7 = scmp.lt.s32.totalorder %s345_s30, %s1396_s28  ;;  %p1399_p12 = scmp.lt.s32.totalorder %s1397_s1, %s1390_s2 }
  0xfa   : > { %p1394_p10 = pneg %p1393_p8 }
  0xfb   : > { %p1400_p5 = por %p1399_p12, %p1398_p7 }
  0xfd   : > { %p1401_p9 = pnand %p1400_p5, %p1394_p10 }
  0xff   : > { %1404 = shalt.err (!%p1401_p9)
}
 0x100   : > { %1047 = dma.hbm_to_vmem [thread:$0]  (!%p2200_p11), %s1939_s10, 16, %s345_s30, %s1793_s6  }
 0x101   : > { %s2203_s12 = sld [smem:[#allocation28_spill]] }
 0x107   : > { %p2204_p1 = scmp.ne.s32.totalorder %s2203_s12, 0 }
 0x108   : > { %s355_s13 = sand.u32 (!%p2204_p1), 1, %s1539_s8   ;;  %p2205_p2 = scmp.ne.s32.totalorder (!%p2204_p1), %s2186_s3, 0 }
 0x109   : > { %353 = sbr.rel (%p2204_p1) target bundleno = 1038 (0x40e), region = 48  ;;  %s1991_s21 = sshll.u32 (!%p2204_p1), %s355_s13, 3 }
 0x10a   : > { %s356_s5 = scalar_lea.sflag (!%p2204_p1), [#allocation4], %s355_s13  ;;  %s359_s11 = scalar_lea.vmem (!%p2204_p1), [#allocation3], %s1991_s21 }
 0x110   : > { %1490 = dma.done.wait (%p2205_p2), %s356_s5, 128  }
 0x111   : > { %1492 = vsyncadd (%p2205_p2), %s356_s5, 4294967168  ;;  %p2206_p12 = scmp.eq.s32.totalorder %s1689_s15, 0 }
 0x113   : > { %1494 = dma.done.wait (%p2206_p12), [#allocation7], 272   ;;  %p2207_p11 = pmov %p2206_p12 }
 0x115   : > { %1496 = vsyncadd (%p2207_p11), [#allocation7], 4294967024  ;;  %p2208_p6 = pmov %p2207_p11 }
 0x117   : > { %1498 = dma.done.wait (%p2208_p6), [#allocation10], 528   ;;  %p2209_p0 = pmov %p2208_p6 }
 0x118   : > { %s2210_s6 = sld [smem:[#allocation22_spill]]  ;;  %s2211_s10 = sld [smem:[#allocation27_spill]] }
 0x119   : > { %1500 = vsyncadd (%p2209_p0), [#allocation10], 4294966768  ;;  %s380_s20 = sand.u32 1, %s1689_s15  }
 0x11a   : > { %s381_s3 = scalar_lea.sflag [#allocation13], %s380_s20 }
 0x11e   : > { %s382_s30 = sand.u32 1, %s2210_s6   ;;  %p2212_p13 = scmp.ne.s32.totalorder %s2211_s10, 0 }
 0x11f   : > { %s917_s27 = sshll.u32 %s382_s30, 6 }
 0x120   : > { %s2008_s18 = scalar_lea.vmem [#allocation12], %s917_s27 }
 0x121   : > { %1502 = dma.done.wait (%p2212_p13), %s381_s3, 1040  }
 0x122   : > { %1504 = vsyncadd (%p2212_p13), %s381_s3, 4294966256  ;;  %s429_s24 = sand.u32 1, %s1515_s25   ;;  %s2019_s2 = scalar_lea.vmem [#allocation14], %s382_s30 }
 0x123   : > { %s2017_s22 = sshll.u32 %s429_s24, 3  ;;  %s2213_s19 = sld [smem:[#allocation23_spill]] }
 0x124   : > { %s431_s15 = scalar_lea.vmem [#allocation15], %s2017_s22 }
 0x129   : > { %p919_p3 = scmp.ne.s32.totalorder %s2213_s19, 0 }
 0x12a   : > { %v1185_v0 = vld [vmem:[#allocation6] sm:$0xff] (!%p919_p3)   ;;  %v1575_v1 = vmov (!%p919_p3), 0.0   ;;  %v1186_v2 = vld [vmem:[#allocation6 + $0x8] sm:$0xff] (!%p919_p3)   ;;  %vm1576_vm0 = vmmov (!%p919_p3), 0   ;;  %v437_v3 = vld [vmem:[%s359_s11] sm:$0xff] (!%p919_p3)  ;;  %vm462_vm1 = vcmask (!%p919_p3), 261120  }
 0x12b   : > { %436 = sbr.rel (%p919_p3) target bundleno = 742 (0x2e6), region = 80  ;;  %961 = vmatprep.subr.bf16.mxu0 (!%p919_p3), %v1575_v1  ;;  %969 = vmatprep.subr.bf16.mxu1 (!%p919_p3), %v1575_v1  ;;  %v1187_v4 = vld [vmem:[#allocation9] sm:$0xff] (!%p919_p3)   ;;  %v1188_v5 = vld [vmem:[#allocation9 + $0x8] sm:$0xff] (!%p919_p3)   ;;  %v438_v6 = vpack.c.bf16 (!%p919_p3), %v437_v3, %v437_v3  ;;  %v1189_v7 = vld [vmem:[#allocation9 + $0x10] sm:$0xff] (!%p919_p3)   ;;  %vm547_vm2 = vcmask (!%p919_p3), 523264  }
 0x12c   : > { %962 = vmatpush3.bf16.msra.mxu0 (!%p919_p3), %v1185_v0  ;;  %965 = vmatprep.mubr.msk.bf16.mxu0 (!%p919_p3), %vm1576_vm0, %v1575_v1  ;;  %v1190_v8 = vld [vmem:[#allocation9 + $0x18] sm:$0xff] (!%p919_p3)   ;;  %v924_v17 = vld [vmem:[#allocation11] ss:$0 sm:$0xff] (!%p919_p3) }
 0x12d   : > { %963 = vmatprep.subr.bf16.mxu0 (!%p919_p3), %v1575_v1  ;;  %977 = vmatprep.mubr.msk.bf16.mxu1 (!%p919_p3), %vm1576_vm0, %v1575_v1  ;;  %v920_v9 = vld [vmem:[#allocation8] ss:$0 sm:$0xff] (!%p919_p3) }
 0x12e   : > { %970 = vmatpush3.bf16.msra.mxu1 (!%p919_p3), %v1187_v4 }
 0x12f   : > { %971 = vmatprep.subr.bf16.mxu1 (!%p919_p3), %v1575_v1 }
 0x130   : > { %964 = vmatpush3.bf16.msra.mxu0 (!%p919_p3), %v1186_v2 }
 0x132   : > { %972 = vmatpush3.bf16.msra.mxu1 %v1188_v5 }
 0x133   : > { %966 = vmatmul.mubr.msk.bf16.vlgmr.msra.gmra.mrb[0].mxu0 %vm462_vm1, %v438_v6  ;;  %973 = vmatprep.subr.bf16.mxu1 %v1575_v1 }
 0x136   : > { %974 = vmatpush3.bf16.msra.mxu1 %v1189_v7 }
 0x137   : > { %975 = vmatprep.subr.bf16.mxu1 %v1575_v1 }
 0x13a   : > { %976 = vmatpush3.bf16.msra.mxu1 %v1190_v8 }
 0x206   : > { %v500_v10 = vpop.f32.mrb[0].mxu0 }
 0x207   : > { %v501_v11 = vadd.f32 %v920_v9, %v500_v10  ;;  %v967_v12 = vpop.f32.mrb[1].mxu0 }
 0x208   : > { %v503_v13 = vpop.f32.mrb[2].mxu0 }
 0x209   : > { %v506_v14 = vmax.f32 %v501_v11, 0.0  ;;  %v968_v15 = vpop.f32.mrb[3].mxu0 }
 0x20b   : > { %v507_v16 = vpack.c.bf16 %v506_v14, %v506_v14 }
 0x20d   : > { %978 = vmatmul.mubr.msk.bf16.vlgmr.msra.gmra.mrb[0].mxu1 %vm547_vm2, %v507_v16 }
 0x2e0   : > { %v585_v18 = vpop.f32.mrb[0].mxu1 }
 0x2e1   : > { %v586_v19 = vadd.f32 %v924_v17, %v585_v18  ;;  %v979_v20 = vpop.f32.mrb[1].mxu1 }
 0x2e2   : > { %v588_v21 = vpop.f32.mrb[2].mxu1 }
 0x2e3   : > { %v591_v22 = vpack.c.bf16 %v586_v19, %v586_v19  ;;  %v980_v23 = vpop.f32.mrb[3].mxu1 }
 0x2e5   : > { %592 = vst [vmem:[#allocation2] sm:$0xf] %v591_v22 }
 0x2e6 PF: > { %v1191_v24 = vld [vmem:[%s2008_s18] sm:$0xff]   ;;  %v1577_v25 = vmov 0.0   ;;  %v1192_v26 = vld [vmem:[%s2008_s18 + $0x8] sm:$0xff]   ;;  %vm1578_vm3 = vmmov 0   ;;  %v1193_v27 = vld [vmem:[%s2008_s18 + $0x10] sm:$0xff]   ;;  %s2214_s28 = sld [smem:[#allocation24_spill]] }
 0x2e7   : > { %981 = vmatprep.subr.bf16.mxu0 %v1577_v25  ;;  %997 = vmatprep.mubr.msk.bf16.mxu0 %vm1578_vm3, %v1577_v25  ;;  %v1194_v28 = vld [vmem:[%s2008_s18 + $0x18] sm:$0xff]   ;;  %v1195_v29 = vld [vmem:[%s2008_s18 + $0x20] sm:$0xff]   ;;  %v1196_v30 = vld [vmem:[%s2008_s18 + $0x28] sm:$0xff]   ;;  %s2215_s1 = sld [smem:[#allocation23_spill]]  ;;  %s737_s5 = sshll.u32 %s431_s15, 4  ;;  %s2041_s5 = int_to_ptr.vmem [resolvable:$true] %s737_s5 }
 0x2e8   : > { %982 = vmatpush3.bf16.msra.mxu0 %v1191_v24  ;;  %v1197_v31 = vld [vmem:[%s2008_s18 + $0x30] sm:$0xff]   ;;  %v1198_v32 = vld [vmem:[%s2008_s18 + $0x38] sm:$0xff]   ;;  %s2216_s10 = sld [smem:[#allocation40_spill]]  ;;  %s722_s27 = scalar_lea.sflag [#allocation5], %s429_s24 }
 0x2e9   : > { %983 = vmatprep.subr.bf16.mxu0 %v1577_v25  ;;  %v930_v34 = vld [vmem:[%s2019_s2] ss:$0 sm:$0xff]  ;;  %s1405_s3 = scalar_lea.vmem %s2041_s5, 128  ;;  %p2218_p8 = scmp.ne.s32.totalorder %s2191_s16, 0 }
 0x2ea   : > { %p1406_p4 = scmp.ne.s32.totalorder %s2041_s5, %s1405_s3  ;;  %s1579_s18 = smov [#allocation15]  }
 0x2eb   : > { %s1409_s2 = sshll.u32 %s1579_s18, 4  ;;  %s1410_s2 = int_to_ptr.vmem [resolvable:$false] %s1409_s2 }
 0x2ec   : > { %984 = vmatpush3.bf16.msra.mxu0 %v1192_v26  ;;  %v593_v33 = vld [vmem:[#allocation2] sm:$0xf]  ;;  %s940_s12 = sshll.u32 %s2214_s28, 1  ;;  %p1407_p10 = pnand %p1406_p4, %p2218_p8 }
 0x2ed   : > { %985 = vmatprep.subr.bf16.mxu0 %v1577_v25  ;;  %s733_s13 = sadd.s32 %s2215_s1, %s940_s12  ;;  %s1411_s19 = scalar_lea.vmem %s1410_s2, 256 }
 0x2ee   : > { %s941_s21 = sshll.u32 %s733_s13, 7  ;;  %s2217_s20 = smov %s2216_s10 }
 0x2ef   : > { %s2039_s30 = scalar_lea.hbm %s2216_s10, %s941_s21  ;;  %p1408_p7 = pneg %p1407_p10 }
 0x2f0   : > { %986 = vmatpush3.bf16.msra.mxu0 %v1193_v27  ;;  %p1412_p5 = scmp.lt.s32.totalorder %s2041_s5, %s1410_s2  ;;  %p1413_p9 = scmp.lt.s32.totalorder %s1411_s19, %s1405_s3 }
 0x2f1   : > { %987 = vmatprep.subr.bf16.mxu0 %v1577_v25 }
 0x2f2   : > { %p1414_p1 = por %p1413_p9, %p1412_p5 }
 0x2f4   : > { %988 = vmatpush3.bf16.msra.mxu0 %v1194_v28  ;;  %p1415_p2 = pnand %p1414_p1, %p1408_p7 }
 0x2f5   : > { %989 = vmatprep.subr.bf16.mxu0 %v1577_v25 }
 0x2f8   : > { %990 = vmatpush3.bf16.msra.mxu0 %v1195_v29 }
 0x2f9   : > { %991 = vmatprep.subr.bf16.mxu0 %v1577_v25 }
 0x2fc   : > { %992 = vmatpush3.bf16.msra.mxu0 %v1196_v30 }
 0x2fd   : > { %993 = vmatprep.subr.bf16.mxu0 %v1577_v25 }
 0x300   : > { %994 = vmatpush3.bf16.msra.mxu0 %v1197_v31 }
 0x301   : > { %995 = vmatprep.subr.bf16.mxu0 %v1577_v25 }
 0x304   : > { %996 = vmatpush3.bf16.msra.mxu0 %v1198_v32 }
 0x307   : > { %998 = vmatmul.mubr.bf16.vlgmr.msra.gmra.mrb[0].mxu0 %v593_v33 }
 0x3da   : > { %v699_v35 = vpop.f32.mrb[0].mxu0 }
 0x3db   : > { %v700_v36 = vadd.f32 %v930_v34, %v699_v35  ;;  %v999_v37 = vpop.f32.mrb[1].mxu0 }
 0x3dc   : > { %v702_v38 = vpop.f32.mrb[2].mxu0 }
 0x3dd   : > { %v706_v39 = vand.u32 2147483647, %v700_v36  ;;  %v1000_v40 = vpop.f32.mrb[3].mxu0  ;;  %v705_v51 = vmax.f32 %v700_v36, 0.0 }
 0x3df   : > { %v707_v41 = vsub.f32 0.0, %v706_v39 }
 0x3e1   : > { %v708_v42 = vmul.f32 1.442695, %v707_v41 }
 0x3e3   : > { %1199 = vpow2.f32 %v708_v42 }
 0x3ed   : > { %v1200_v43 = vpop.eup %1199 }
 0x3ee   : > { %v710_v44 = vadd.f32 1.0, %v1200_v43  ;;  %v713_v45 = vmul.f32 -0.5, %v1200_v43  ;;  %v716_v47 = vand.u32 2147483647, %v1200_v43 }
 0x3f0   : > { %1201 = vlog2.f32 %v710_v44  ;;  %v714_v46 = vadd.f32 1.0, %v713_v45  ;;  %vm717_vm4 = vcmp.lt.f32.partialorder %v716_v47, 0.0004427343 }
 0x3f2   : > { %v715_v50 = vmul.f32 %v1200_v43, %v714_v46 }
 0x3fa   : > { %v1202_v48 = vpop.eup %1201 }
 0x3fb   : > { %v712_v49 = vmul.f32 0.6931472, %v1202_v48 }
 0x3fd   : > { %v718_v52 = vsel %vm717_vm4, %v715_v50, %v712_v49 }
 0x3fe   : > { %v719_v53 = vadd.f32 %v718_v52, %v705_v51 }
 0x400   : > { %720 = vst [vmem:[%s431_s15] sm:$0xff] %v719_v53 }
 0x401   : > { %1418 = shalt.err (!%p1415_p2)
}
 0x402   : > { %s1419_s24 = scalar_lea.hbm %s2039_s30, 128  ;;  %s1423_s28 = scalar_lea.hbm %s2217_s20, 512 }
 0x403   : > { %p1420_p12 = scmp.ne.s32.totalorder %s2039_s30, %s1419_s24  ;;  %p1424_p0 = scmp.lt.u32.totalorder %s2039_s30, %s2217_s20 }
 0x404   : > { %p1425_p13 = scmp.lt.u32.totalorder %s1423_s28, %s1419_s24  ;;  %p1427_p4 = scmp.lt.u32.totalorder %s1419_s24, %s2039_s30 }
 0x405   : > { %p1421_p11 = pnand %p1420_p12, %p2218_p8 }
 0x406   : > { %p1426_p3 = por %p1425_p13, %p1424_p0 }
 0x407   : > { %p1422_p6 = pneg %p1421_p11 }
 0x408   : > { %p1428_p10 = por %p1427_p4, %p1426_p3 }
 0x40a   : > { %p1429_p7 = pnand %p1428_p10, %p1422_p6 }
 0x40c   : > { %1432 = shalt.err (!%p1429_p7)
}
 0x40d   : > { %1023 = dma.vmem_to_hbm [thread:$0]  (%p2218_p8), %s2041_s5, 128, %s2039_s30, %s722_s27  }
 0x40e PF: > { %s2219_s13 = sld [smem:[#allocation21_spill]]  ;;  %p1061_p5 = scmp.ge.s32.totalorder %s1563_s14, 2 }
 0x40f   : > { %p2220_p9 = scmp.ne.s32.totalorder %s2192_s17, 0 }
 0x411   : > { %p1049_p1 = pnand %p1061_p5, %p2220_p9 }
 0x414   : > { %s749_s21 = sand.u32 1, %s2219_s13  }
 0x415   : > { %s750_s11 = scalar_lea.sflag [#allocation5], %s749_s21 }
 0x416   : > { %1506 = dma.done.wait (!%p1049_p1), %s750_s11, 128  }
 0x417   : > { %1508 = vsyncadd (!%p1049_p1), %s750_s11, 4294967168  ;;  %s28_s14 = sadd.s32 1, %s1563_s14   ;;  %s2222_s27 = sld [smem:[#allocation22_spill]] }
 0x418   : > { %p2073_p2 = scmp.ge.s32.totalorder %s28_s14, 6   ;;  %s2223_s16 = sld [smem:[#allocation32_spill]] }
 0x419   : > { %s2224_s10 = sld [smem:[#allocation25_spill]]  ;;  %s2225_s11 = sld [smem:[#allocation26_spill]] }
 0x41a   : > { %s2226_s12 = sld [smem:[#allocation30_spill]]  ;;  %s2227_s13 = sld [smem:[#allocation31_spill]] }
 0x41b   : > { %s2228_s24 = smov %s1515_s25  ;;  %s2229_s25 = smov %s1519_s26 }
 0x41c   : > { %s2230_s26 = smov %s1899_s7  ;;  %s2231_s28 = smov %s1531_s29 }
 0x41d   : > { %s2232_s29 = smov %s1888_s23  ;;  %s2233_s30 = smov %s1539_s8 }
 0x41e   : > { %s2234_s8 = smov %s1543_s9  ;;  %s2235_s9 = smov %s2223_s16 }
 0x41f   :  { %27 = sbr.rel (!%p2073_p2) target bundleno = 23 (0x17), region = 137 }
 0x426   :  { %755 = vsyncpa [#allocation4], 1 }
 0x427   :  { %757 = vsyncpa [#allocation4 + $0x1], 1 }
 0x428   :  { %758 = vsyncpa [#allocation7], 1 }
 0x429   :  { %759 = vsyncpa [#allocation10], 1 }
 0x42a   :  { %760 = vsyncpa [#allocation13], 1 }
 0x42b   :  { %762 = vsyncpa [#allocation13 + $0x1], 1 }
 0x42c   :  { %763 = vsyncpa [#allocation5], 1 }
 0x42d   :  { %765 = vsyncpa [#allocation5 + $0x1], 1 }

</bundles_post_ra>
